<compile_context>
chip_gen: v7x
topology: tpu7x:2x2x1
jax: 0.10.0
libtpu: 0.0.40
codegen_flags: <defaults>
</compile_context>

<pallas_src>
import jax
import jax.numpy as jnp
from jax.experimental import pallas as pl
from jax.experimental.pallas import tpu as pltpu


def _einsum_pointwise_kernel(x_ref, w_ref, x2_ref, w2_ref, b_ref, o_ref):
    # x_ref : (B, TN, I)   w_ref : (TN, I, O)
    # x2_ref: (B, TN, I)   w2_ref: (B, TN, I, O)   b_ref: (TN, O)
    # o_ref : (B, TN, O)
    B, TN, I = x_ref.shape
    O = o_ref.shape[-1]

    # bf16 inputs: keep the dominant products in bf16 (packed VPU on v6e/v7x)
    # and accumulate in f32.  f32 inputs (the test path): everything in f32.
    keep_native = x_ref.dtype == jnp.bfloat16

    def up(v):
        return v if keep_native else v.astype(jnp.float32)

    # Single f32 accumulator, initialized with the pre-fused bias.  The
    # broadcast is hoisted out of the loop (JAX does not CSE broadcast_in_dim).
    acc = jnp.broadcast_to(b_ref[...].astype(jnp.float32)[None, :, :], (B, TN, O))

    # Fully-unrolled fused reduction over the contraction axis I.  Per-i slices
    # are loaded straight from the refs (strided VMEM loads), so no
    # (B, TN, I, O) f32 temporary ever exists.  I is a static block dim; for
    # very large I a chunked fori_loop would be preferable (not needed here).
    for i in range(I):
        xi = up(x_ref[:, :, pl.ds(i, 1)])      # (B, TN, 1) keepdims: no relayout
        x2i = up(x2_ref[:, :, pl.ds(i, 1)])    # (B, TN, 1)
        wi = up(w_ref[:, i, :])                # (TN, O)    strided VMEM load
        w2i = up(w2_ref[:, :, i, :])           # (B, TN, O)
        acc = acc + xi * wi[None, :, :] + x2i * w2i

    # O < 128 gives masked (vst.msk) stores; padding O in the wrapper would
    # multiply HBM traffic on the DMA-bound w2 stream, so we accept it here.
    # TODO(synk): if production O < 128 and the kernel turns VALU-bound on
    # v7x, repack to a lane-dense output layout instead.
    o_ref[...] = acc.astype(o_ref.dtype)


def _round_up(x, m):
    return ((x + m - 1) // m) * m


def _vmem_limit_bytes():
    """Generation-aware scoped-VMEM limit: ~75% of physical per-core VMEM."""
    cap = 0
    try:
        cap = int(getattr(pltpu.get_tpu_info(), "vmem_capacity_bytes", 0))
    except Exception:
        cap = 0
    if cap <= 0:
        cap = 64 * 1024 * 1024          # conservative fallback (v7x per-TC VMEM)
    return (cap * 3) // 4               # 128 MiB -> 96 MiB, 64 MiB -> 48 MiB


def _choose_tn(n, tn_max):
    """Rows of N per grid step.

    (8,128) legality: TN == N or TN % 8 == 0 (TN is the sublane dim of the
    x / bias / out blocks).  Prefer >= 2 grid steps (v7x megacore) and the
    largest budget-fitting tile; allow a ragged last block (Pallas clips the
    partial block) instead of falling back to an unbounded TN == N tile.
    """
    if n <= 8:
        return n
    cap = min(tn_max, n // 2) if n >= 16 else min(tn_max, n)
    cap = (cap // 8) * 8
    if cap >= 8:
        for t in range(cap, 7, -8):     # prefer a divisor of N (no ragged tail)
            if n % t == 0:
                return t
        return cap                      # ragged tail; still layout-legal
    return 8                            # minimum legal multi-block tile


def einsum_to_pointwise(inp, weights, bias, inp2, weights2, bias2):
    B, N, I = inp.shape
    O = weights.shape[-1]
    dtype = inp.dtype

    # Fuse the two biases: one fewer DMA stream / double-buffer and one fewer
    # VPU add per tile.  The (N, O) add in XLA is negligible.
    bias_total = (bias + bias2).astype(dtype)                     # (N, O)

    # --- generation- and padding-aware VMEM planning --------------------------
    isz = jnp.dtype(dtype).itemsize
    i_lane, o_lane, i_sub = _round_up(I, 128), _round_up(O, 128), _round_up(I, 8)
    per_n_x = B * i_lane * isz            # x / x2 blocks   (B, TN, I)
    per_n_w = i_sub * o_lane * isz        # weights block   (TN, I, O)
    per_n_w2 = B * i_sub * o_lane * isz   # weights2 block  (B, TN, I, O)
    per_n_b = o_lane * isz                # fused bias      (TN, O)
    per_n_out = B * o_lane * isz          # output block    (B, TN, O)
    per_n_acc = B * o_lane * 4            # in-kernel f32 accumulator
    w2_bufs = 3                           # reserve for triple-buffering w2
    per_n = (2 * (2 * per_n_x + per_n_w + per_n_b + per_n_out)
             + w2_bufs * per_n_w2 + per_n_acc)

    vmem_limit = _vmem_limit_bytes()
    budget = (vmem_limit * 7) // 10       # stay well inside the scoped limit
    TN = _choose_tn(N, max(1, budget // per_n))
    steps = (N + TN - 1) // TN

    # Deepen pipelining on the dominant (w2) stream only when it can pay off.
    w2_block = (B, TN, I, O)
    w2_map = lambda n: (0, n, 0, 0)
    if steps >= 3:
        try:
            w2_spec = pl.BlockSpec(w2_block, w2_map, pipeline_mode=pl.Buffered(3))
        except TypeError:                 # older BlockSpec signature
            w2_spec = pl.BlockSpec(w2_block, w2_map)
    else:
        w2_spec = pl.BlockSpec(w2_block, w2_map)

    return pl.pallas_call(
        _einsum_pointwise_kernel,
        out_shape=jax.ShapeDtypeStruct((B, N, O), dtype),
        grid_spec=pltpu.PrefetchScalarGridSpec(
            num_scalar_prefetch=0,
            grid=(steps,),
            in_specs=[
                pl.BlockSpec((B, TN, I), lambda n: (0, n, 0)),    # input
                pl.BlockSpec((TN, I, O), lambda n: (n, 0, 0)),    # weights
                pl.BlockSpec((B, TN, I), lambda n: (0, n, 0)),    # input2
                w2_spec,                                          # weights2
                pl.BlockSpec((TN, O), lambda n: (n, 0)),          # fused bias
            ],
            out_specs=pl.BlockSpec((B, TN, O), lambda n: (0, n, 0)),
        ),
        compiler_params=pltpu.CompilerParams(
            dimension_semantics=("parallel",),
            vmem_limit_bytes=vmem_limit,
        ),
    )(inp, weights, inp2, weights2, bias_total)


if __name__ == "__main__":
    B, N, I, O = 2, 4, 16, 32
    key = jax.random.PRNGKey(0)
    k = jax.random.split(key, 6)
    inp = jax.random.normal(k[0], (B, N, I), dtype=jnp.float32)
    weights = jax.random.normal(k[1], (N, I, O), dtype=jnp.float32)
    bias = jax.random.normal(k[2], (N, O), dtype=jnp.float32)
    inp2 = jax.random.normal(k[3], (B, N, I), dtype=jnp.float32)
    weights2 = jax.random.normal(k[4], (B, N, I, O), dtype=jnp.float32)
    bias2 = jax.random.normal(k[5], (N, O), dtype=jnp.float32)

    out = jax.jit(einsum_to_pointwise)(inp, weights, bias, inp2, weights2, bias2)
    out = jax.block_until_ready(out)

    # Pure-JAX reference (mirrors the PyTorch forward).
    ref = (jnp.einsum("bni,nio->bno", inp, weights) + bias
           + jnp.einsum("bni,bnio->bno", inp2, weights2) + bias2)
    assert out.shape == (B, N, O)
    assert jnp.allclose(out, ref, atol=1e-4, rtol=1e-4), "mismatch vs reference"
    print("KERNEL_OK")
</pallas_src>

<mosaic_0001>
module attributes {stable_mosaic.version = 11 : i64} {
  func.func @_einsum_pointwise_kernel(%arg0: i32, %arg1: memref<2x4x16xf32, #tpu.memory_space<vmem>>, %arg2: memref<4x16x32xf32, #tpu.memory_space<vmem>>, %arg3: memref<2x4x16xf32, #tpu.memory_space<vmem>>, %arg4: memref<2x4x16x32xf32, #tpu.memory_space<vmem>>, %arg5: memref<4x32xf32, #tpu.memory_space<vmem>>, %arg6: memref<2x4x32xf32, #tpu.memory_space<vmem>>) attributes {dimension_semantics = [#tpu.dimension_semantics<parallel>], iteration_bounds = array<i64: 1>, scalar_prefetch = 0 : i64, scratch_operands = 0 : i64, tpu.core_type = #tpu.core_type<tc>, window_params = [{transform_indices = @transform_0, window_bounds = array<i64: 2, 4, 16>}, {transform_indices = @transform_1, window_bounds = array<i64: 4, 16, 32>}, {transform_indices = @transform_2, window_bounds = array<i64: 2, 4, 16>}, {transform_indices = @transform_3, window_bounds = array<i64: 2, 4, 16, 32>}, {transform_indices = @transform_4, window_bounds = array<i64: 4, 32>}, {transform_indices = @transform_5, window_bounds = array<i64: 2, 4, 32>}]} {
    %c0 = arith.constant 0 : index
    %c0_0 = arith.constant 0 : index
    %0 = vector.load %arg5[%c0, %c0_0] : memref<4x32xf32, #tpu.memory_space<vmem>>, vector<4x32xf32>
    %1 = vector.shape_cast %0 : vector<4x32xf32> to vector<1x4x32xf32>
    %2 = vector.shape_cast %1 : vector<1x4x32xf32> to vector<1x4x32xf32>
    %3 = vector.broadcast %2 : vector<1x4x32xf32> to vector<2x4x32xf32>
    %c0_1 = arith.constant 0 : index
    %c0_2 = arith.constant 0 : index
    %c0_3 = arith.constant 0 : index
    %4 = vector.load %arg1[%c0_1, %c0_2, %c0_3] : memref<2x4x16xf32, #tpu.memory_space<vmem>>, vector<2x4x1xf32>
    %c0_4 = arith.constant 0 : index
    %c0_5 = arith.constant 0 : index
    %c0_6 = arith.constant 0 : index
    %5 = vector.load %arg3[%c0_4, %c0_5, %c0_6] : memref<2x4x16xf32, #tpu.memory_space<vmem>>, vector<2x4x1xf32>
    %c0_7 = arith.constant 0 : index
    %c0_8 = arith.constant 0 : index
    %c0_9 = arith.constant 0 : index
    %6 = vector.load %arg2[%c0_7, %c0_8, %c0_9] : memref<4x16x32xf32, #tpu.memory_space<vmem>>, vector<4x1x32xf32>
    %7 = vector.shape_cast %6 : vector<4x1x32xf32> to vector<4x32xf32>
    %c0_10 = arith.constant 0 : index
    %c0_11 = arith.constant 0 : index
    %c0_12 = arith.constant 0 : index
    %c0_13 = arith.constant 0 : index
    %8 = vector.load %arg4[%c0_10, %c0_11, %c0_12, %c0_13] : memref<2x4x16x32xf32, #tpu.memory_space<vmem>>, vector<2x4x1x32xf32>
    %9 = vector.shape_cast %8 : vector<2x4x1x32xf32> to vector<2x4x32xf32>
    %10 = vector.shape_cast %7 : vector<4x32xf32> to vector<1x4x32xf32>
    %11 = vector.broadcast %4 : vector<2x4x1xf32> to vector<2x4x32xf32>
    %12 = vector.broadcast %10 : vector<1x4x32xf32> to vector<2x4x32xf32>
    %13 = arith.mulf %11, %12 : vector<2x4x32xf32>
    %14 = arith.addf %3, %13 : vector<2x4x32xf32>
    %15 = vector.broadcast %5 : vector<2x4x1xf32> to vector<2x4x32xf32>
    %16 = arith.mulf %15, %9 : vector<2x4x32xf32>
    %17 = arith.addf %14, %16 : vector<2x4x32xf32>
    %c0_14 = arith.constant 0 : index
    %c0_15 = arith.constant 0 : index
    %c1 = arith.constant 1 : index
    %18 = vector.load %arg1[%c0_14, %c0_15, %c1] : memref<2x4x16xf32, #tpu.memory_space<vmem>>, vector<2x4x1xf32>
    %c0_16 = arith.constant 0 : index
    %c0_17 = arith.constant 0 : index
    %c1_18 = arith.constant 1 : index
    %19 = vector.load %arg3[%c0_16, %c0_17, %c1_18] : memref<2x4x16xf32, #tpu.memory_space<vmem>>, vector<2x4x1xf32>
    %c0_19 = arith.constant 0 : index
    %c1_20 = arith.constant 1 : index
    %c0_21 = arith.constant 0 : index
    %20 = vector.load %arg2[%c0_19, %c1_20, %c0_21] : memref<4x16x32xf32, #tpu.memory_space<vmem>>, vector<4x1x32xf32>
    %21 = vector.shape_cast %20 : vector<4x1x32xf32> to vector<4x32xf32>
    %c0_22 = arith.constant 0 : index
    %c0_23 = arith.constant 0 : index
    %c1_24 = arith.constant 1 : index
    %c0_25 = arith.constant 0 : index
    %22 = vector.load %arg4[%c0_22, %c0_23, %c1_24, %c0_25] : memref<2x4x16x32xf32, #tpu.memory_space<vmem>>, vector<2x4x1x32xf32>
    %23 = vector.shape_cast %22 : vector<2x4x1x32xf32> to vector<2x4x32xf32>
    %24 = vector.shape_cast %21 : vector<4x32xf32> to vector<1x4x32xf32>
    %25 = vector.broadcast %18 : vector<2x4x1xf32> to vector<2x4x32xf32>
    %26 = vector.broadcast %24 : vector<1x4x32xf32> to vector<2x4x32xf32>
    %27 = arith.mulf %25, %26 : vector<2x4x32xf32>
    %28 = arith.addf %17, %27 : vector<2x4x32xf32>
    %29 = vector.broadcast %19 : vector<2x4x1xf32> to vector<2x4x32xf32>
    %30 = arith.mulf %29, %23 : vector<2x4x32xf32>
    %31 = arith.addf %28, %30 : vector<2x4x32xf32>
    %c0_26 = arith.constant 0 : index
    %c0_27 = arith.constant 0 : index
    %c2 = arith.constant 2 : index
    %32 = vector.load %arg1[%c0_26, %c0_27, %c2] : memref<2x4x16xf32, #tpu.memory_space<vmem>>, vector<2x4x1xf32>
    %c0_28 = arith.constant 0 : index
    %c0_29 = arith.constant 0 : index
    %c2_30 = arith.constant 2 : index
    %33 = vector.load %arg3[%c0_28, %c0_29, %c2_30] : memref<2x4x16xf32, #tpu.memory_space<vmem>>, vector<2x4x1xf32>
    %c0_31 = arith.constant 0 : index
    %c2_32 = arith.constant 2 : index
    %c0_33 = arith.constant 0 : index
    %34 = vector.load %arg2[%c0_31, %c2_32, %c0_33] : memref<4x16x32xf32, #tpu.memory_space<vmem>>, vector<4x1x32xf32>
    %35 = vector.shape_cast %34 : vector<4x1x32xf32> to vector<4x32xf32>
    %c0_34 = arith.constant 0 : index
    %c0_35 = arith.constant 0 : index
    %c2_36 = arith.constant 2 : index
    %c0_37 = arith.constant 0 : index
    %36 = vector.load %arg4[%c0_34, %c0_35, %c2_36, %c0_37] : memref<2x4x16x32xf32, #tpu.memory_space<vmem>>, vector<2x4x1x32xf32>
    %37 = vector.shape_cast %36 : vector<2x4x1x32xf32> to vector<2x4x32xf32>
    %38 = vector.shape_cast %35 : vector<4x32xf32> to vector<1x4x32xf32>
    %39 = vector.broadcast %32 : vector<2x4x1xf32> to vector<2x4x32xf32>
    %40 = vector.broadcast %38 : vector<1x4x32xf32> to vector<2x4x32xf32>
    %41 = arith.mulf %39, %40 : vector<2x4x32xf32>
    %42 = arith.addf %31, %41 : vector<2x4x32xf32>
    %43 = vector.broadcast %33 : vector<2x4x1xf32> to vector<2x4x32xf32>
    %44 = arith.mulf %43, %37 : vector<2x4x32xf32>
    %45 = arith.addf %42, %44 : vector<2x4x32xf32>
    %c0_38 = arith.constant 0 : index
    %c0_39 = arith.constant 0 : index
    %c3 = arith.constant 3 : index
    %46 = vector.load %arg1[%c0_38, %c0_39, %c3] : memref<2x4x16xf32, #tpu.memory_space<vmem>>, vector<2x4x1xf32>
    %c0_40 = arith.constant 0 : index
    %c0_41 = arith.constant 0 : index
    %c3_42 = arith.constant 3 : index
    %47 = vector.load %arg3[%c0_40, %c0_41, %c3_42] : memref<2x4x16xf32, #tpu.memory_space<vmem>>, vector<2x4x1xf32>
    %c0_43 = arith.constant 0 : index
    %c3_44 = arith.constant 3 : index
    %c0_45 = arith.constant 0 : index
    %48 = vector.load %arg2[%c0_43, %c3_44, %c0_45] : memref<4x16x32xf32, #tpu.memory_space<vmem>>, vector<4x1x32xf32>
    %49 = vector.shape_cast %48 : vector<4x1x32xf32> to vector<4x32xf32>
    %c0_46 = arith.constant 0 : index
    %c0_47 = arith.constant 0 : index
    %c3_48 = arith.constant 3 : index
    %c0_49 = arith.constant 0 : index
    %50 = vector.load %arg4[%c0_46, %c0_47, %c3_48, %c0_49] : memref<2x4x16x32xf32, #tpu.memory_space<vmem>>, vector<2x4x1x32xf32>
    %51 = vector.shape_cast %50 : vector<2x4x1x32xf32> to vector<2x4x32xf32>
    %52 = vector.shape_cast %49 : vector<4x32xf32> to vector<1x4x32xf32>
    %53 = vector.broadcast %46 : vector<2x4x1xf32> to vector<2x4x32xf32>
    %54 = vector.broadcast %52 : vector<1x4x32xf32> to vector<2x4x32xf32>
    %55 = arith.mulf %53, %54 : vector<2x4x32xf32>
    %56 = arith.addf %45, %55 : vector<2x4x32xf32>
    %57 = vector.broadcast %47 : vector<2x4x1xf32> to vector<2x4x32xf32>
    %58 = arith.mulf %57, %51 : vector<2x4x32xf32>
    %59 = arith.addf %56, %58 : vector<2x4x32xf32>
    %c0_50 = arith.constant 0 : index
    %c0_51 = arith.constant 0 : index
    %c4 = arith.constant 4 : index
    %60 = vector.load %arg1[%c0_50, %c0_51, %c4] : memref<2x4x16xf32, #tpu.memory_space<vmem>>, vector<2x4x1xf32>
    %c0_52 = arith.constant 0 : index
    %c0_53 = arith.constant 0 : index
    %c4_54 = arith.constant 4 : index
    %61 = vector.load %arg3[%c0_52, %c0_53, %c4_54] : memref<2x4x16xf32, #tpu.memory_space<vmem>>, vector<2x4x1xf32>
    %c0_55 = arith.constant 0 : index
    %c4_56 = arith.constant 4 : index
    %c0_57 = arith.constant 0 : index
    %62 = vector.load %arg2[%c0_55, %c4_56, %c0_57] : memref<4x16x32xf32, #tpu.memory_space<vmem>>, vector<4x1x32xf32>
    %63 = vector.shape_cast %62 : vector<4x1x32xf32> to vector<4x32xf32>
    %c0_58 = arith.constant 0 : index
    %c0_59 = arith.constant 0 : index
    %c4_60 = arith.constant 4 : index
    %c0_61 = arith.constant 0 : index
    %64 = vector.load %arg4[%c0_58, %c0_59, %c4_60, %c0_61] : memref<2x4x16x32xf32, #tpu.memory_space<vmem>>, vector<2x4x1x32xf32>
    %65 = vector.shape_cast %64 : vector<2x4x1x32xf32> to vector<2x4x32xf32>
    %66 = vector.shape_cast %63 : vector<4x32xf32> to vector<1x4x32xf32>
    %67 = vector.broadcast %60 : vector<2x4x1xf32> to vector<2x4x32xf32>
    %68 = vector.broadcast %66 : vector<1x4x32xf32> to vector<2x4x32xf32>
    %69 = arith.mulf %67, %68 : vector<2x4x32xf32>
    %70 = arith.addf %59, %69 : vector<2x4x32xf32>
    %71 = vector.broadcast %61 : vector<2x4x1xf32> to vector<2x4x32xf32>
    %72 = arith.mulf %71, %65 : vector<2x4x32xf32>
    %73 = arith.addf %70, %72 : vector<2x4x32xf32>
    %c0_62 = arith.constant 0 : index
    %c0_63 = arith.constant 0 : index
    %c5 = arith.constant 5 : index
    %74 = vector.load %arg1[%c0_62, %c0_63, %c5] : memref<2x4x16xf32, #tpu.memory_space<vmem>>, vector<2x4x1xf32>
    %c0_64 = arith.constant 0 : index
    %c0_65 = arith.constant 0 : index
    %c5_66 = arith.constant 5 : index
    %75 = vector.load %arg3[%c0_64, %c0_65, %c5_66] : memref<2x4x16xf32, #tpu.memory_space<vmem>>, vector<2x4x1xf32>
    %c0_67 = arith.constant 0 : index
    %c5_68 = arith.constant 5 : index
    %c0_69 = arith.constant 0 : index
    %76 = vector.load %arg2[%c0_67, %c5_68, %c0_69] : memref<4x16x32xf32, #tpu.memory_space<vmem>>, vector<4x1x32xf32>
    %77 = vector.shape_cast %76 : vector<4x1x32xf32> to vector<4x32xf32>
    %c0_70 = arith.constant 0 : index
    %c0_71 = arith.constant 0 : index
    %c5_72 = arith.constant 5 : index
    %c0_73 = arith.constant 0 : index
    %78 = vector.load %arg4[%c0_70, %c0_71, %c5_72, %c0_73] : memref<2x4x16x32xf32, #tpu.memory_space<vmem>>, vector<2x4x1x32xf32>
    %79 = vector.shape_cast %78 : vector<2x4x1x32xf32> to vector<2x4x32xf32>
    %80 = vector.shape_cast %77 : vector<4x32xf32> to vector<1x4x32xf32>
    %81 = vector.broadcast %74 : vector<2x4x1xf32> to vector<2x4x32xf32>
    %82 = vector.broadcast %80 : vector<1x4x32xf32> to vector<2x4x32xf32>
    %83 = arith.mulf %81, %82 : vector<2x4x32xf32>
    %84 = arith.addf %73, %83 : vector<2x4x32xf32>
    %85 = vector.broadcast %75 : vector<2x4x1xf32> to vector<2x4x32xf32>
    %86 = arith.mulf %85, %79 : vector<2x4x32xf32>
    %87 = arith.addf %84, %86 : vector<2x4x32xf32>
    %c0_74 = arith.constant 0 : index
    %c0_75 = arith.constant 0 : index
    %c6 = arith.constant 6 : index
    %88 = vector.load %arg1[%c0_74, %c0_75, %c6] : memref<2x4x16xf32, #tpu.memory_space<vmem>>, vector<2x4x1xf32>
    %c0_76 = arith.constant 0 : index
    %c0_77 = arith.constant 0 : index
    %c6_78 = arith.constant 6 : index
    %89 = vector.load %arg3[%c0_76, %c0_77, %c6_78] : memref<2x4x16xf32, #tpu.memory_space<vmem>>, vector<2x4x1xf32>
    %c0_79 = arith.constant 0 : index
    %c6_80 = arith.constant 6 : index
    %c0_81 = arith.constant 0 : index
    %90 = vector.load %arg2[%c0_79, %c6_80, %c0_81] : memref<4x16x32xf32, #tpu.memory_space<vmem>>, vector<4x1x32xf32>
    %91 = vector.shape_cast %90 : vector<4x1x32xf32> to vector<4x32xf32>
    %c0_82 = arith.constant 0 : index
    %c0_83 = arith.constant 0 : index
    %c6_84 = arith.constant 6 : index
    %c0_85 = arith.constant 0 : index
    %92 = vector.load %arg4[%c0_82, %c0_83, %c6_84, %c0_85] : memref<2x4x16x32xf32, #tpu.memory_space<vmem>>, vector<2x4x1x32xf32>
    %93 = vector.shape_cast %92 : vector<2x4x1x32xf32> to vector<2x4x32xf32>
    %94 = vector.shape_cast %91 : vector<4x32xf32> to vector<1x4x32xf32>
    %95 = vector.broadcast %88 : vector<2x4x1xf32> to vector<2x4x32xf32>
    %96 = vector.broadcast %94 : vector<1x4x32xf32> to vector<2x4x32xf32>
    %97 = arith.mulf %95, %96 : vector<2x4x32xf32>
    %98 = arith.addf %87, %97 : vector<2x4x32xf32>
    %99 = vector.broadcast %89 : vector<2x4x1xf32> to vector<2x4x32xf32>
    %100 = arith.mulf %99, %93 : vector<2x4x32xf32>
    %101 = arith.addf %98, %100 : vector<2x4x32xf32>
    %c0_86 = arith.constant 0 : index
    %c0_87 = arith.constant 0 : index
    %c7 = arith.constant 7 : index
    %102 = vector.load %arg1[%c0_86, %c0_87, %c7] : memref<2x4x16xf32, #tpu.memory_space<vmem>>, vector<2x4x1xf32>
    %c0_88 = arith.constant 0 : index
    %c0_89 = arith.constant 0 : index
    %c7_90 = arith.constant 7 : index
    %103 = vector.load %arg3[%c0_88, %c0_89, %c7_90] : memref<2x4x16xf32, #tpu.memory_space<vmem>>, vector<2x4x1xf32>
    %c0_91 = arith.constant 0 : index
    %c7_92 = arith.constant 7 : index
    %c0_93 = arith.constant 0 : index
    %104 = vector.load %arg2[%c0_91, %c7_92, %c0_93] : memref<4x16x32xf32, #tpu.memory_space<vmem>>, vector<4x1x32xf32>
    %105 = vector.shape_cast %104 : vector<4x1x32xf32> to vector<4x32xf32>
    %c0_94 = arith.constant 0 : index
    %c0_95 = arith.constant 0 : index
    %c7_96 = arith.constant 7 : index
    %c0_97 = arith.constant 0 : index
    %106 = vector.load %arg4[%c0_94, %c0_95, %c7_96, %c0_97] : memref<2x4x16x32xf32, #tpu.memory_space<vmem>>, vector<2x4x1x32xf32>
    %107 = vector.shape_cast %106 : vector<2x4x1x32xf32> to vector<2x4x32xf32>
    %108 = vector.shape_cast %105 : vector<4x32xf32> to vector<1x4x32xf32>
    %109 = vector.broadcast %102 : vector<2x4x1xf32> to vector<2x4x32xf32>
    %110 = vector.broadcast %108 : vector<1x4x32xf32> to vector<2x4x32xf32>
    %111 = arith.mulf %109, %110 : vector<2x4x32xf32>
    %112 = arith.addf %101, %111 : vector<2x4x32xf32>
    %113 = vector.broadcast %103 : vector<2x4x1xf32> to vector<2x4x32xf32>
    %114 = arith.mulf %113, %107 : vector<2x4x32xf32>
    %115 = arith.addf %112, %114 : vector<2x4x32xf32>
    %c0_98 = arith.constant 0 : index
    %c0_99 = arith.constant 0 : index
    %c8 = arith.constant 8 : index
    %116 = vector.load %arg1[%c0_98, %c0_99, %c8] : memref<2x4x16xf32, #tpu.memory_space<vmem>>, vector<2x4x1xf32>
    %c0_100 = arith.constant 0 : index
    %c0_101 = arith.constant 0 : index
    %c8_102 = arith.constant 8 : index
    %117 = vector.load %arg3[%c0_100, %c0_101, %c8_102] : memref<2x4x16xf32, #tpu.memory_space<vmem>>, vector<2x4x1xf32>
    %c0_103 = arith.constant 0 : index
    %c8_104 = arith.constant 8 : index
    %c0_105 = arith.constant 0 : index
    %118 = vector.load %arg2[%c0_103, %c8_104, %c0_105] : memref<4x16x32xf32, #tpu.memory_space<vmem>>, vector<4x1x32xf32>
    %119 = vector.shape_cast %118 : vector<4x1x32xf32> to vector<4x32xf32>
    %c0_106 = arith.constant 0 : index
    %c0_107 = arith.constant 0 : index
    %c8_108 = arith.constant 8 : index
    %c0_109 = arith.constant 0 : index
    %120 = vector.load %arg4[%c0_106, %c0_107, %c8_108, %c0_109] : memref<2x4x16x32xf32, #tpu.memory_space<vmem>>, vector<2x4x1x32xf32>
    %121 = vector.shape_cast %120 : vector<2x4x1x32xf32> to vector<2x4x32xf32>
    %122 = vector.shape_cast %119 : vector<4x32xf32> to vector<1x4x32xf32>
    %123 = vector.broadcast %116 : vector<2x4x1xf32> to vector<2x4x32xf32>
    %124 = vector.broadcast %122 : vector<1x4x32xf32> to vector<2x4x32xf32>
    %125 = arith.mulf %123, %124 : vector<2x4x32xf32>
    %126 = arith.addf %115, %125 : vector<2x4x32xf32>
    %127 = vector.broadcast %117 : vector<2x4x1xf32> to vector<2x4x32xf32>
    %128 = arith.mulf %127, %121 : vector<2x4x32xf32>
    %129 = arith.addf %126, %128 : vector<2x4x32xf32>
    %c0_110 = arith.constant 0 : index
    %c0_111 = arith.constant 0 : index
    %c9 = arith.constant 9 : index
    %130 = vector.load %arg1[%c0_110, %c0_111, %c9] : memref<2x4x16xf32, #tpu.memory_space<vmem>>, vector<2x4x1xf32>
    %c0_112 = arith.constant 0 : index
    %c0_113 = arith.constant 0 : index
    %c9_114 = arith.constant 9 : index
    %131 = vector.load %arg3[%c0_112, %c0_113, %c9_114] : memref<2x4x16xf32, #tpu.memory_space<vmem>>, vector<2x4x1xf32>
    %c0_115 = arith.constant 0 : index
    %c9_116 = arith.constant 9 : index
    %c0_117 = arith.constant 0 : index
    %132 = vector.load %arg2[%c0_115, %c9_116, %c0_117] : memref<4x16x32xf32, #tpu.memory_space<vmem>>, vector<4x1x32xf32>
    %133 = vector.shape_cast %132 : vector<4x1x32xf32> to vector<4x32xf32>
    %c0_118 = arith.constant 0 : index
    %c0_119 = arith.constant 0 : index
    %c9_120 = arith.constant 9 : index
    %c0_121 = arith.constant 0 : index
    %134 = vector.load %arg4[%c0_118, %c0_119, %c9_120, %c0_121] : memref<2x4x16x32xf32, #tpu.memory_space<vmem>>, vector<2x4x1x32xf32>
    %135 = vector.shape_cast %134 : vector<2x4x1x32xf32> to vector<2x4x32xf32>
    %136 = vector.shape_cast %133 : vector<4x32xf32> to vector<1x4x32xf32>
    %137 = vector.broadcast %130 : vector<2x4x1xf32> to vector<2x4x32xf32>
    %138 = vector.broadcast %136 : vector<1x4x32xf32> to vector<2x4x32xf32>
    %139 = arith.mulf %137, %138 : vector<2x4x32xf32>
    %140 = arith.addf %129, %139 : vector<2x4x32xf32>
    %141 = vector.broadcast %131 : vector<2x4x1xf32> to vector<2x4x32xf32>
    %142 = arith.mulf %141, %135 : vector<2x4x32xf32>
    %143 = arith.addf %140, %142 : vector<2x4x32xf32>
    %c0_122 = arith.constant 0 : index
    %c0_123 = arith.constant 0 : index
    %c10 = arith.constant 10 : index
    %144 = vector.load %arg1[%c0_122, %c0_123, %c10] : memref<2x4x16xf32, #tpu.memory_space<vmem>>, vector<2x4x1xf32>
    %c0_124 = arith.constant 0 : index
    %c0_125 = arith.constant 0 : index
    %c10_126 = arith.constant 10 : index
    %145 = vector.load %arg3[%c0_124, %c0_125, %c10_126] : memref<2x4x16xf32, #tpu.memory_space<vmem>>, vector<2x4x1xf32>
    %c0_127 = arith.constant 0 : index
    %c10_128 = arith.constant 10 : index
    %c0_129 = arith.constant 0 : index
    %146 = vector.load %arg2[%c0_127, %c10_128, %c0_129] : memref<4x16x32xf32, #tpu.memory_space<vmem>>, vector<4x1x32xf32>
    %147 = vector.shape_cast %146 : vector<4x1x32xf32> to vector<4x32xf32>
    %c0_130 = arith.constant 0 : index
    %c0_131 = arith.constant 0 : index
    %c10_132 = arith.constant 10 : index
    %c0_133 = arith.constant 0 : index
    %148 = vector.load %arg4[%c0_130, %c0_131, %c10_132, %c0_133] : memref<2x4x16x32xf32, #tpu.memory_space<vmem>>, vector<2x4x1x32xf32>
    %149 = vector.shape_cast %148 : vector<2x4x1x32xf32> to vector<2x4x32xf32>
    %150 = vector.shape_cast %147 : vector<4x32xf32> to vector<1x4x32xf32>
    %151 = vector.broadcast %144 : vector<2x4x1xf32> to vector<2x4x32xf32>
    %152 = vector.broadcast %150 : vector<1x4x32xf32> to vector<2x4x32xf32>
    %153 = arith.mulf %151, %152 : vector<2x4x32xf32>
    %154 = arith.addf %143, %153 : vector<2x4x32xf32>
    %155 = vector.broadcast %145 : vector<2x4x1xf32> to vector<2x4x32xf32>
    %156 = arith.mulf %155, %149 : vector<2x4x32xf32>
    %157 = arith.addf %154, %156 : vector<2x4x32xf32>
    %c0_134 = arith.constant 0 : index
    %c0_135 = arith.constant 0 : index
    %c11 = arith.constant 11 : index
    %158 = vector.load %arg1[%c0_134, %c0_135, %c11] : memref<2x4x16xf32, #tpu.memory_space<vmem>>, vector<2x4x1xf32>
    %c0_136 = arith.constant 0 : index
    %c0_137 = arith.constant 0 : index
    %c11_138 = arith.constant 11 : index
    %159 = vector.load %arg3[%c0_136, %c0_137, %c11_138] : memref<2x4x16xf32, #tpu.memory_space<vmem>>, vector<2x4x1xf32>
    %c0_139 = arith.constant 0 : index
    %c11_140 = arith.constant 11 : index
    %c0_141 = arith.constant 0 : index
    %160 = vector.load %arg2[%c0_139, %c11_140, %c0_141] : memref<4x16x32xf32, #tpu.memory_space<vmem>>, vector<4x1x32xf32>
    %161 = vector.shape_cast %160 : vector<4x1x32xf32> to vector<4x32xf32>
    %c0_142 = arith.constant 0 : index
    %c0_143 = arith.constant 0 : index
    %c11_144 = arith.constant 11 : index
    %c0_145 = arith.constant 0 : index
    %162 = vector.load %arg4[%c0_142, %c0_143, %c11_144, %c0_145] : memref<2x4x16x32xf32, #tpu.memory_space<vmem>>, vector<2x4x1x32xf32>
    %163 = vector.shape_cast %162 : vector<2x4x1x32xf32> to vector<2x4x32xf32>
    %164 = vector.shape_cast %161 : vector<4x32xf32> to vector<1x4x32xf32>
    %165 = vector.broadcast %158 : vector<2x4x1xf32> to vector<2x4x32xf32>
    %166 = vector.broadcast %164 : vector<1x4x32xf32> to vector<2x4x32xf32>
    %167 = arith.mulf %165, %166 : vector<2x4x32xf32>
    %168 = arith.addf %157, %167 : vector<2x4x32xf32>
    %169 = vector.broadcast %159 : vector<2x4x1xf32> to vector<2x4x32xf32>
    %170 = arith.mulf %169, %163 : vector<2x4x32xf32>
    %171 = arith.addf %168, %170 : vector<2x4x32xf32>
    %c0_146 = arith.constant 0 : index
    %c0_147 = arith.constant 0 : index
    %c12 = arith.constant 12 : index
    %172 = vector.load %arg1[%c0_146, %c0_147, %c12] : memref<2x4x16xf32, #tpu.memory_space<vmem>>, vector<2x4x1xf32>
    %c0_148 = arith.constant 0 : index
    %c0_149 = arith.constant 0 : index
    %c12_150 = arith.constant 12 : index
    %173 = vector.load %arg3[%c0_148, %c0_149, %c12_150] : memref<2x4x16xf32, #tpu.memory_space<vmem>>, vector<2x4x1xf32>
    %c0_151 = arith.constant 0 : index
    %c12_152 = arith.constant 12 : index
    %c0_153 = arith.constant 0 : index
    %174 = vector.load %arg2[%c0_151, %c12_152, %c0_153] : memref<4x16x32xf32, #tpu.memory_space<vmem>>, vector<4x1x32xf32>
    %175 = vector.shape_cast %174 : vector<4x1x32xf32> to vector<4x32xf32>
    %c0_154 = arith.constant 0 : index
    %c0_155 = arith.constant 0 : index
    %c12_156 = arith.constant 12 : index
    %c0_157 = arith.constant 0 : index
    %176 = vector.load %arg4[%c0_154, %c0_155, %c12_156, %c0_157] : memref<2x4x16x32xf32, #tpu.memory_space<vmem>>, vector<2x4x1x32xf32>
    %177 = vector.shape_cast %176 : vector<2x4x1x32xf32> to vector<2x4x32xf32>
    %178 = vector.shape_cast %175 : vector<4x32xf32> to vector<1x4x32xf32>
    %179 = vector.broadcast %172 : vector<2x4x1xf32> to vector<2x4x32xf32>
    %180 = vector.broadcast %178 : vector<1x4x32xf32> to vector<2x4x32xf32>
    %181 = arith.mulf %179, %180 : vector<2x4x32xf32>
    %182 = arith.addf %171, %181 : vector<2x4x32xf32>
    %183 = vector.broadcast %173 : vector<2x4x1xf32> to vector<2x4x32xf32>
    %184 = arith.mulf %183, %177 : vector<2x4x32xf32>
    %185 = arith.addf %182, %184 : vector<2x4x32xf32>
    %c0_158 = arith.constant 0 : index
    %c0_159 = arith.constant 0 : index
    %c13 = arith.constant 13 : index
    %186 = vector.load %arg1[%c0_158, %c0_159, %c13] : memref<2x4x16xf32, #tpu.memory_space<vmem>>, vector<2x4x1xf32>
    %c0_160 = arith.constant 0 : index
    %c0_161 = arith.constant 0 : index
    %c13_162 = arith.constant 13 : index
    %187 = vector.load %arg3[%c0_160, %c0_161, %c13_162] : memref<2x4x16xf32, #tpu.memory_space<vmem>>, vector<2x4x1xf32>
    %c0_163 = arith.constant 0 : index
    %c13_164 = arith.constant 13 : index
    %c0_165 = arith.constant 0 : index
    %188 = vector.load %arg2[%c0_163, %c13_164, %c0_165] : memref<4x16x32xf32, #tpu.memory_space<vmem>>, vector<4x1x32xf32>
    %189 = vector.shape_cast %188 : vector<4x1x32xf32> to vector<4x32xf32>
    %c0_166 = arith.constant 0 : index
    %c0_167 = arith.constant 0 : index
    %c13_168 = arith.constant 13 : index
    %c0_169 = arith.constant 0 : index
    %190 = vector.load %arg4[%c0_166, %c0_167, %c13_168, %c0_169] : memref<2x4x16x32xf32, #tpu.memory_space<vmem>>, vector<2x4x1x32xf32>
    %191 = vector.shape_cast %190 : vector<2x4x1x32xf32> to vector<2x4x32xf32>
    %192 = vector.shape_cast %189 : vector<4x32xf32> to vector<1x4x32xf32>
    %193 = vector.broadcast %186 : vector<2x4x1xf32> to vector<2x4x32xf32>
    %194 = vector.broadcast %192 : vector<1x4x32xf32> to vector<2x4x32xf32>
    %195 = arith.mulf %193, %194 : vector<2x4x32xf32>
    %196 = arith.addf %185, %195 : vector<2x4x32xf32>
    %197 = vector.broadcast %187 : vector<2x4x1xf32> to vector<2x4x32xf32>
    %198 = arith.mulf %197, %191 : vector<2x4x32xf32>
    %199 = arith.addf %196, %198 : vector<2x4x32xf32>
    %c0_170 = arith.constant 0 : index
    %c0_171 = arith.constant 0 : index
    %c14 = arith.constant 14 : index
    %200 = vector.load %arg1[%c0_170, %c0_171, %c14] : memref<2x4x16xf32, #tpu.memory_space<vmem>>, vector<2x4x1xf32>
    %c0_172 = arith.constant 0 : index
    %c0_173 = arith.constant 0 : index
    %c14_174 = arith.constant 14 : index
    %201 = vector.load %arg3[%c0_172, %c0_173, %c14_174] : memref<2x4x16xf32, #tpu.memory_space<vmem>>, vector<2x4x1xf32>
    %c0_175 = arith.constant 0 : index
    %c14_176 = arith.constant 14 : index
    %c0_177 = arith.constant 0 : index
    %202 = vector.load %arg2[%c0_175, %c14_176, %c0_177] : memref<4x16x32xf32, #tpu.memory_space<vmem>>, vector<4x1x32xf32>
    %203 = vector.shape_cast %202 : vector<4x1x32xf32> to vector<4x32xf32>
    %c0_178 = arith.constant 0 : index
    %c0_179 = arith.constant 0 : index
    %c14_180 = arith.constant 14 : index
    %c0_181 = arith.constant 0 : index
    %204 = vector.load %arg4[%c0_178, %c0_179, %c14_180, %c0_181] : memref<2x4x16x32xf32, #tpu.memory_space<vmem>>, vector<2x4x1x32xf32>
    %205 = vector.shape_cast %204 : vector<2x4x1x32xf32> to vector<2x4x32xf32>
    %206 = vector.shape_cast %203 : vector<4x32xf32> to vector<1x4x32xf32>
    %207 = vector.broadcast %200 : vector<2x4x1xf32> to vector<2x4x32xf32>
    %208 = vector.broadcast %206 : vector<1x4x32xf32> to vector<2x4x32xf32>
    %209 = arith.mulf %207, %208 : vector<2x4x32xf32>
    %210 = arith.addf %199, %209 : vector<2x4x32xf32>
    %211 = vector.broadcast %201 : vector<2x4x1xf32> to vector<2x4x32xf32>
    %212 = arith.mulf %211, %205 : vector<2x4x32xf32>
    %213 = arith.addf %210, %212 : vector<2x4x32xf32>
    %c0_182 = arith.constant 0 : index
    %c0_183 = arith.constant 0 : index
    %c15 = arith.constant 15 : index
    %214 = vector.load %arg1[%c0_182, %c0_183, %c15] : memref<2x4x16xf32, #tpu.memory_space<vmem>>, vector<2x4x1xf32>
    %c0_184 = arith.constant 0 : index
    %c0_185 = arith.constant 0 : index
    %c15_186 = arith.constant 15 : index
    %215 = vector.load %arg3[%c0_184, %c0_185, %c15_186] : memref<2x4x16xf32, #tpu.memory_space<vmem>>, vector<2x4x1xf32>
    %c0_187 = arith.constant 0 : index
    %c15_188 = arith.constant 15 : index
    %c0_189 = arith.constant 0 : index
    %216 = vector.load %arg2[%c0_187, %c15_188, %c0_189] : memref<4x16x32xf32, #tpu.memory_space<vmem>>, vector<4x1x32xf32>
    %217 = vector.shape_cast %216 : vector<4x1x32xf32> to vector<4x32xf32>
    %c0_190 = arith.constant 0 : index
    %c0_191 = arith.constant 0 : index
    %c15_192 = arith.constant 15 : index
    %c0_193 = arith.constant 0 : index
    %218 = vector.load %arg4[%c0_190, %c0_191, %c15_192, %c0_193] : memref<2x4x16x32xf32, #tpu.memory_space<vmem>>, vector<2x4x1x32xf32>
    %219 = vector.shape_cast %218 : vector<2x4x1x32xf32> to vector<2x4x32xf32>
    %220 = vector.shape_cast %217 : vector<4x32xf32> to vector<1x4x32xf32>
    %221 = vector.broadcast %214 : vector<2x4x1xf32> to vector<2x4x32xf32>
    %222 = vector.broadcast %220 : vector<1x4x32xf32> to vector<2x4x32xf32>
    %223 = arith.mulf %221, %222 : vector<2x4x32xf32>
    %224 = arith.addf %213, %223 : vector<2x4x32xf32>
    %225 = vector.broadcast %215 : vector<2x4x1xf32> to vector<2x4x32xf32>
    %226 = arith.mulf %225, %219 : vector<2x4x32xf32>
    %227 = arith.addf %224, %226 : vector<2x4x32xf32>
    %c0_194 = arith.constant 0 : index
    %c0_195 = arith.constant 0 : index
    %c0_196 = arith.constant 0 : index
    %228 = vector.load %arg6[%c0_194, %c0_195, %c0_196] : memref<2x4x32xf32, #tpu.memory_space<vmem>>, vector<2x4x32xf32>
    tpu.vector_store %arg6[%c0_194, %c0_195, %c0_196], %227 {strides = array<i32>} : memref<2x4x32xf32, #tpu.memory_space<vmem>>, vector<2x4x32xf32>,
    return
  }
  func.func @transform_0(%arg0: i32) -> (i32, i32, i32) {
    %c0_i32 = arith.constant 0 : i32
    %c0_i32_0 = arith.constant 0 : i32
    %c0_i32_1 = arith.constant 0 : i32
    return %c0_i32, %arg0, %c0_i32_0 : i32, i32, i32
  }
  func.func @transform_1(%arg0: i32) -> (i32, i32, i32) {
    %c0_i32 = arith.constant 0 : i32
    %c0_i32_0 = arith.constant 0 : i32
    %c0_i32_1 = arith.constant 0 : i32
    return %arg0, %c0_i32, %c0_i32_0 : i32, i32, i32
  }
  func.func @transform_2(%arg0: i32) -> (i32, i32, i32) {
    %c0_i32 = arith.constant 0 : i32
    %c0_i32_0 = arith.constant 0 : i32
    %c0_i32_1 = arith.constant 0 : i32
    return %c0_i32, %arg0, %c0_i32_0 : i32, i32, i32
  }
  func.func @transform_3(%arg0: i32) -> (i32, i32, i32, i32) {
    %c0_i32 = arith.constant 0 : i32
    %c0_i32_0 = arith.constant 0 : i32
    %c0_i32_1 = arith.constant 0 : i32
    %c0_i32_2 = arith.constant 0 : i32
    return %c0_i32, %arg0, %c0_i32_0, %c0_i32_1 : i32, i32, i32, i32
  }
  func.func @transform_4(%arg0: i32) -> (i32, i32) {
    %c0_i32 = arith.constant 0 : i32
    %c0_i32_0 = arith.constant 0 : i32
    return %arg0, %c0_i32 : i32, i32
  }
  func.func @transform_5(%arg0: i32) -> (i32, i32, i32) {
    %c0_i32 = arith.constant 0 : i32
    %c0_i32_0 = arith.constant 0 : i32
    %c0_i32_1 = arith.constant 0 : i32
    return %c0_i32, %arg0, %c0_i32_0 : i32, i32, i32
  }
}

</mosaic_0001>

<bundles_post_ra>
// kernel: einsum_to_pointwise.1
= control target key start
LH: loop header
LB: loop body
LE: loop exit
PB: predicated region body
PF: predicated region fallthrough
CT: control target
= control target key end

     0   :  { %10 = vsyncpa [#allocation3], 0  ;;  %s1831_s0 = inlined_call_operand.vmem [shape: f32[2,4,16], index: 0, kind: input, shape index: {}]   ;;  %s1832_s1 = inlined_call_operand.hbm [shape: f32[4,16,32], index: 1, kind: input, shape index: {}]   ;;  %s1833_s2 = inlined_call_operand.vmem [shape: f32[2,4,16], index: 2, kind: input, shape index: {}]   ;;  %s1834_s3 = inlined_call_operand.hbm [shape: f32[2,4,16,32], index: 3, kind: input, shape index: {}]   ;;  %s1835_s4 = inlined_call_operand.vmem [shape: f32[4,32], index: 4, kind: input, shape index: {}]   ;;  %s1836_s5 = inlined_call_operand.hbm [shape: f32[2,4,32], index: 5, kind: output, shape index: {}]  }
   0x1   :  { %11 = vsyncpa [#allocation6], 0 }
   0x2   :  { %12 = vsyncpa [#allocation4], 0  ;;  %s1313_s18 = smov [#allocation2]   ;;  %s1241_s22 = scalar_lea.hbm %s1832_s1, 1024 }
   0x3   :  { %s20_s19 = sshll.u32 %s1313_s18, 4  ;;  %p1242_p0 = scmp.ne.s32.totalorder %s1832_s1, %s1241_s22  ;;  %s21_s19 = int_to_ptr.vmem [resolvable:$true] %s20_s19 }
   0x4   :  { %p1245_p1 = scmp.lt.u32.totalorder %s1241_s22, %s1832_s1 }
   0x6   :  { %p1247_p2 = pnand %p1245_p1, %p1242_p0 }
   0x8   :  { %1250 = shalt.err (!%p1247_p2)
}
   0x9   :  { %s1251_s27 = scalar_lea.vmem %s21_s19, 1024  ;;  %p1256_p4 = scmp.lt.s32.totalorder %s21_s19, %s21_s19 }
   0xa   :  { %p1252_p3 = scmp.ne.s32.totalorder %s21_s19, %s1251_s27  ;;  %p1257_p5 = scmp.lt.s32.totalorder %s1251_s27, %s1251_s27 }
   0xc   :  { %p1258_p6 = por %p1257_p5, %p1256_p4 }
   0xe   :  { %p1259_p7 = pnand %p1258_p6, %p1252_p3 }
  0x10   :  { %1262 = shalt.err (!%p1259_p7)
}
  0x11   :  { %s1314_s28 = smov 128   ;;  %s1315_s29 = smov 8  }
  0x12   :  { %26 = dma.hbm_to_vmem [thread:$0]  %s1832_s1, 1024, %s21_s19, [#allocation3], %s1314_s28, %s1314_s28, %s1315_s29  }
  0x13   :  { %s1316_s7 = smov [#allocation5]   ;;  %s1263_s11 = scalar_lea.hbm %s1834_s3, 2048 }
  0x14   :  { %s34_s8 = sshll.u32 %s1316_s7, 4  ;;  %p1264_p8 = scmp.ne.s32.totalorder %s1834_s3, %s1263_s11  ;;  %s35_s8 = int_to_ptr.vmem [resolvable:$true] %s34_s8 }
  0x15   :  { %p1267_p9 = scmp.lt.u32.totalorder %s1263_s11, %s1834_s3 }
  0x17   :  { %p1269_p10 = pnand %p1267_p9, %p1264_p8 }
  0x19   :  { %1272 = shalt.err (!%p1269_p10)
}
  0x1a   :  { %s1273_s16 = scalar_lea.vmem %s35_s8, 2048  ;;  %p1278_p12 = scmp.lt.s32.totalorder %s35_s8, %s35_s8 }
  0x1b   :  { %p1274_p11 = scmp.ne.s32.totalorder %s35_s8, %s1273_s16  ;;  %p1279_p13 = scmp.lt.s32.totalorder %s1273_s16, %s1273_s16 }
  0x1d   :  { %p1280_p0 = por %p1279_p13, %p1278_p12 }
  0x1f   :  { %p1281_p1 = pnand %p1280_p0, %p1274_p11 }
  0x21   :  { %1284 = shalt.err (!%p1281_p1)
}
  0x22   :  { %40 = dma.hbm_to_vmem [thread:$0]  %s1834_s3, 2048, %s35_s8, [#allocation6], %s1314_s28, %s1314_s28, %s1315_s29  }
  0x23   :  { %1307 = dma.done.wait [#allocation3], 1024  }
  0x24   :  { %1308 = vsyncadd [#allocation3], 4294966272 }
  0x25   :  { %1309 = dma.done.wait [#allocation6], 2048  }
  0x26   :  { %1310 = vsyncadd [#allocation6], 4294965248  ;;  %v1317_v0 = vmov 0   ;;  %v1393_v1 = vld [vmem:[%s1833_s2] sm:$0xf]  ;;  %v1318_v5 = vmov 1  }
  0x27   :  { %1210 = vset.pattern.permute.xlu1 %v1317_v0  ;;  %1209 = vset.pattern.permute.xlu0 %v1317_v0  ;;  %v1398_v2 = vld [vmem:[%s1831_s0] sm:$0xf]  ;;  %v1405_v3 = vld [vmem:[%s1833_s2 + $0x4] sm:$0xf]  ;;  %v1319_v6 = vmov 2   ;;  %v1320_v7 = vmov 3  }
  0x28   :  { %96 = vperm.xlu1 %1210, %v1393_v1   ;;  %68 = vperm.xlu0 %1209, %v1398_v2   ;;  %v1410_v4 = vld [vmem:[%s1831_s0 + $0x4] sm:$0xf]  ;;  %v1321_v8 = vmov 4   ;;  %v1322_v9 = vmov 5   ;;  %v1323_v10 = vmov 6   ;;  %v1324_v11 = vmov 7  }
  0x29   :  { %v1325_v12 = vmov 8   ;;  %v1326_v13 = vmov 9   ;;  %v1327_v14 = vmov 10   ;;  %v1328_v15 = vmov 11   ;;  %v55_v20 = vld [vmem:[#allocation2 + $0x10] sm:$0x1] }
  0x2a   :  { %v1329_v16 = vmov 12   ;;  %v1330_v17 = vmov 13   ;;  %v1331_v18 = vmov 14   ;;  %v1332_v19 = vmov 15   ;;  %v56_v21 = vld [vmem:[#allocation2 + $0x20] sm:$0x1] }
  0x2b   :  { %v80_v22 = vrot.slane %v55_v20, 7  ;;  %v63_v23 = vld [vmem:[#allocation5 + $0x50] sm:$0x1]  ;;  %vm81_vm0 = vcmask 1041409   ;;  %v54_v24 = vld [vmem:[#allocation2] sm:$0x1] }
  0x2c   :  { %101 = vperm.xlu1 %1210, %v1405_v3   ;;  %73 = vperm.xlu0 %1209, %v1410_v4   ;;  %v59_v25 = vld [vmem:[#allocation5 + $0x10] sm:$0x1]  ;;  %v83_v27 = vrot.slane %v56_v21, 6  ;;  %v64_v28 = vld [vmem:[#allocation5 + $0x60] sm:$0x1]  ;;  %v118_v29 = vrot.slane %v63_v23, 7 }
  0x2d   :  { %v57_v26 = vld [vmem:[#allocation2 + $0x30] sm:$0x1]  ;;  %v131_v30 = vld [vmem:[#allocation2 + $0x11] sm:$0x1]  ;;  %vm84_vm1 = vcmask 1042434   ;;  %v82_v31 = vsel %vm81_vm0, %v80_v22, %v54_v24  ;;  %v112_v35 = vrot.slane %v59_v25, 7 }
  0x2e   :  { %v62_v32 = vld [vmem:[#allocation5 + $0x40] sm:$0x1]  ;;  %v86_v36 = vrot.slane %v57_v26, 5  ;;  %v65_v37 = vld [vmem:[#allocation5 + $0x70] sm:$0x1]  ;;  %v120_v38 = vrot.slane %v64_v28, 6  ;;  %v85_v41 = vsel %vm84_vm1, %v83_v27, %v82_v31 }
  0x2f   :  { %v58_v33 = vld [vmem:[#allocation5] sm:$0x1]  ;;  %v132_v39 = vld [vmem:[#allocation2 + $0x21] sm:$0x1]  ;;  %v154_v40 = vrot.slane %v131_v30, 7  ;;  %vm87_vm2 = vcmask 1043459   ;;  %v119_v42 = vsel %vm81_vm0, %v118_v29, %v62_v32 }
  0x30   :  { %1212 = vset.pattern.permute.xlu1 %v1318_v5  ;;  %1211 = vset.pattern.permute.xlu0 %v1318_v5  ;;  %v60_v34 = vld [vmem:[#allocation5 + $0x20] sm:$0x1]  ;;  %v130_v43 = vld [vmem:[#allocation2 + $0x1] sm:$0x1]  ;;  %v135_v44 = vld [vmem:[#allocation5 + $0x11] sm:$0x1]  ;;  %v113_v47 = vsel %vm81_vm0, %v112_v35, %v58_v33  ;;  %v88_v53 = vsel %vm87_vm2, %v86_v36, %v85_v41  ;;  %v121_v54 = vsel %vm84_vm1, %v120_v38, %v119_v42 }
  0x31   :  { %147 = vperm.xlu1 %1212, %v1410_v4   ;;  %143 = vperm.xlu0 %1211, %v1398_v2   ;;  %v61_v45 = vld [vmem:[#allocation5 + $0x30] sm:$0x1]  ;;  %v114_v46 = vrot.slane %v60_v34, 6  ;;  %v122_v50 = vrot.slane %v65_v37, 5  ;;  %v133_v51 = vld [vmem:[#allocation2 + $0x31] sm:$0x1]  ;;  %v155_v55 = vsel %vm81_vm0, %v154_v40, %v130_v43 }
  0x32   :  { %v156_v52 = vrot.slane %v132_v39, 6  ;;  %v136_v56 = vld [vmem:[#allocation5 + $0x21] sm:$0x1]  ;;  %v181_v57 = vrot.slane %v135_v44, 7  ;;  %v116_v58 = vrot.slane %v61_v45, 5  ;;  %v158_v62 = vrot.slane %v133_v51, 5 }
  0x33   :  { %v134_v59 = vld [vmem:[#allocation5 + $0x1] sm:$0x1]  ;;  %v200_v60 = vld [vmem:[#allocation2 + $0x12] sm:$0x1]  ;;  %v115_v61 = vsel %vm84_vm1, %v114_v46, %v113_v47  ;;  %v123_v0 = vsel %vm87_vm2, %v122_v50, %v121_v54  ;;  %v201_v20 = vld [vmem:[#allocation2 + $0x22] sm:$0x1] }
  0x34   :  { %v204_v25 = vld [vmem:[#allocation5 + $0x12] sm:$0x1]  ;;  %v140_v28 = vld [vmem:[#allocation5 + $0x61] sm:$0x1]  ;;  %v225_v36 = vrot.slane %v201_v20, 6  ;;  %vm1165_vm3 = vcmask 257024  }
  0x35   :  { %166 = vperm.xlu1 %1212, %v1393_v1   ;;  %170 = vperm.xlu0 %1211, %v1405_v3   ;;  %v138_v33 = vld [vmem:[#allocation5 + $0x41] sm:$0x1]  ;;  %v202_v34 = vld [vmem:[#allocation2 + $0x32] sm:$0x1]  ;;  %v141_v40 = vld [vmem:[#allocation5 + $0x71] sm:$0x1] }
  0x36   :  { %v205_v41 = vld [vmem:[#allocation5 + $0x22] sm:$0x1]  ;;  %v250_v42 = vrot.slane %v204_v25, 7  ;;  %v189_v44 = vrot.slane %v140_v28, 6  ;;  %v208_v46 = vld [vmem:[#allocation5 + $0x52] sm:$0x1] }
  0x37   :  { %v203_v45 = vld [vmem:[#allocation5 + $0x2] sm:$0x1]  ;;  %v227_v51 = vrot.slane %v202_v34, 5  ;;  %v206_v54 = vld [vmem:[#allocation5 + $0x32] sm:$0x1] }
  0x38   :  { %v271_v28 = vld [vmem:[#allocation2 + $0x33] sm:$0x1] }
  0x39   :  { %1213 = vset.pattern.permute.xlu1 %v1319_v6  ;;  %1214 = vset.pattern.permute.xlu0 %v1319_v6 }
  0x3a   :  { %212 = vperm.xlu1 %1213, %v1398_v2   ;;  %216 = vperm.xlu0 %1214, %v1410_v4  }
  0x3e   :  { %235 = vperm.xlu1 %1213, %v1393_v1   ;;  %1215 = vset.pattern.permute.xlu0 %v1320_v7 }
  0x3f   :  { %281 = vperm.xlu0 %1215, %v1398_v2  }
  0x42   :  { %239 = vperm.xlu1 %1213, %v1405_v3  }
  0x43   :  { %308 = vperm.xlu0 %1215, %v1405_v3  }
  0x46   :  { %1216 = vset.pattern.permute.xlu1 %v1320_v7  ;;  %v157_v7 = vsel %vm84_vm1, %v156_v52, %v155_v55  ;;  %v252_v55 = vrot.slane %v205_v41, 6  ;;  %v275_v41 = vld [vmem:[#allocation5 + $0x33] sm:$0x1] }
  0x47   :  { %285 = vperm.xlu1 %1216, %v1410_v4   ;;  %1218 = vset.pattern.permute.xlu0 %v1321_v8  ;;  %v159_v23 = vsel %vm87_vm2, %v158_v62, %v157_v7 }
  0x48   :  { %354 = vperm.xlu0 %1218, %v1410_v4  }
  0x4b   :  { %304 = vperm.xlu1 %1216, %v1393_v1  }
  0x4c   :  { %1219 = vset.pattern.permute.xlu0 %v1322_v9 }
  0x4d   :  { %419 = vperm.xlu0 %1219, %v1398_v2  }
  0x4f   :  { %1217 = vset.pattern.permute.xlu1 %v1321_v8  ;;  %v137_v8 = vld [vmem:[#allocation5 + $0x31] sm:$0x1] }
  0x50   :  { %350 = vperm.xlu1 %1217, %v1398_v2   ;;  %v185_v24 = vrot.slane %v137_v8, 5  ;;  %v210_v8 = vld [vmem:[#allocation5 + $0x72] sm:$0x1] }
  0x51   :  { %446 = vperm.xlu0 %1219, %v1405_v3  }
  0x54   :  { %373 = vperm.xlu1 %1217, %v1393_v1  }
  0x55   :  { %1222 = vset.pattern.permute.xlu0 %v1323_v10 }
  0x56   :  { %492 = vperm.xlu0 %1222, %v1410_v4  }
  0x58   :  { %377 = vperm.xlu1 %1217, %v1405_v3  }
  0x5a   :  { %1223 = vset.pattern.permute.xlu0 %v1324_v11 }
  0x5b   :  { %557 = vperm.xlu0 %1223, %v1398_v2  }
  0x5c   :  { %1220 = vset.pattern.permute.xlu1 %v1322_v9  ;;  %v183_v9 = vrot.slane %v136_v56, 6 }
  0x5d   :  { %423 = vperm.xlu1 %1220, %v1410_v4  }
  0x5f   :  { %584 = vperm.xlu0 %1223, %v1405_v3  }
  0x61   :  { %442 = vperm.xlu1 %1220, %v1393_v1  }
  0x63   :  { %1226 = vset.pattern.permute.xlu0 %v1325_v12 }
  0x64   :  { %630 = vperm.xlu0 %1226, %v1410_v4  }
  0x65   :  { %1221 = vset.pattern.permute.xlu1 %v1323_v10  ;;  %v49_v10 = vld [vmem:[%s1835_s4] sm:$0xf]  ;;  %s1333_s4 = smov [#allocation7]  }
  0x66   :  { %488 = vperm.xlu1 %1221, %v1398_v2   ;;  %s1173_s25 = sshll.u32 %s1333_s4, 4  ;;  %s1174_s25 = int_to_ptr.vmem [resolvable:$true] %s1173_s25 }
  0x67   :  { %s1285_s26 = scalar_lea.vmem %s1174_s25, 128  ;;  %p1290_p3 = scmp.lt.s32.totalorder %s1174_s25, %s1174_s25 }
  0x68   :  { %1227 = vset.pattern.permute.xlu0 %v1326_v13  ;;  %p1286_p2 = scmp.ne.s32.totalorder %s1174_s25, %s1285_s26  ;;  %p1291_p4 = scmp.lt.s32.totalorder %s1285_s26, %s1285_s26 }
  0x69   :  { %695 = vperm.xlu0 %1227, %v1398_v2  }
  0x6a   :  { %511 = vperm.xlu1 %1221, %v1393_v1   ;;  %p1292_p5 = por %p1291_p4, %p1290_p3 }
  0x6c   :  { %p1293_p6 = pnand %p1292_p5, %p1286_p2 }
  0x6d   :  { %722 = vperm.xlu0 %1227, %v1405_v3  }
  0x6e   :  { %515 = vperm.xlu1 %1221, %v1405_v3  }
  0x71   :  { %1230 = vset.pattern.permute.xlu0 %v1327_v14 }
  0x72   :  { %1224 = vset.pattern.permute.xlu1 %v1324_v11  ;;  %768 = vperm.xlu0 %1230, %v1410_v4  }
  0x73   :  { %561 = vperm.xlu1 %1224, %v1410_v4  }
  0x76   :  { %1231 = vset.pattern.permute.xlu0 %v1328_v15 }
  0x77   :  { %580 = vperm.xlu1 %1224, %v1393_v1   ;;  %833 = vperm.xlu0 %1231, %v1398_v2  }
  0x7b   :  { %1225 = vset.pattern.permute.xlu1 %v1325_v12  ;;  %860 = vperm.xlu0 %1231, %v1405_v3   ;;  %v182_v12 = vsel %vm81_vm0, %v181_v57, %v134_v59  ;;  %v251_v59 = vsel %vm81_vm0, %v250_v42, %v203_v45  ;;  %v338_v45 = vld [vmem:[#allocation2 + $0x14] sm:$0x1] }
  0x7c   :  { %626 = vperm.xlu1 %1225, %v1398_v2   ;;  %v184_v27 = vsel %vm84_vm1, %v183_v9, %v182_v12  ;;  %v253_v7 = vsel %vm84_vm1, %v252_v55, %v251_v59  ;;  %v337_v55 = vld [vmem:[#allocation2 + $0x4] sm:$0x1] }
  0x7d   :  { %v186_v43 = vsel %vm87_vm2, %v185_v24, %v184_v27  ;;  %v343_v59 = vld [vmem:[#allocation5 + $0x24] sm:$0x1] }
  0x7f   :  { %1234 = vset.pattern.permute.xlu0 %v1329_v16 }
  0x80   :  { %649 = vperm.xlu1 %1225, %v1393_v1   ;;  %906 = vperm.xlu0 %1234, %v1410_v4  }
  0x84   :  { %653 = vperm.xlu1 %1225, %v1405_v3   ;;  %1235 = vset.pattern.permute.xlu0 %v1330_v17 }
  0x85   :  { %971 = vperm.xlu0 %1235, %v1398_v2  }
  0x88   :  { %1228 = vset.pattern.permute.xlu1 %v1326_v13  ;;  %v139_v13 = vld [vmem:[#allocation5 + $0x51] sm:$0x1] }
  0x89   :  { %699 = vperm.xlu1 %1228, %v1410_v4   ;;  %998 = vperm.xlu0 %1235, %v1405_v3   ;;  %v187_v29 = vrot.slane %v139_v13, 7 }
  0x8b   :  { %v188_v50 = vsel %vm81_vm0, %v187_v29, %v138_v33  ;;  %v274_v33 = vld [vmem:[#allocation5 + $0x23] sm:$0x1] }
  0x8c   :  { %v190_v62 = vsel %vm84_vm1, %v189_v44, %v188_v50  ;;  %v321_v42 = vrot.slane %v274_v33, 6 }
  0x8d   :  { %718 = vperm.xlu1 %1228, %v1393_v1   ;;  %1238 = vset.pattern.permute.xlu0 %v1331_v18 }
  0x8e   :  { %1044 = vperm.xlu0 %1238, %v1410_v4  }
  0x91   :  { %1229 = vset.pattern.permute.xlu1 %v1327_v14  ;;  %v223_v14 = vrot.slane %v200_v60, 7  ;;  %v209_v60 = vld [vmem:[#allocation5 + $0x62] sm:$0x1] }
  0x92   :  { %764 = vperm.xlu1 %1229, %v1398_v2   ;;  %1239 = vset.pattern.permute.xlu0 %v1332_v19  ;;  %v258_v9 = vrot.slane %v209_v60, 6 }
  0x93   :  { %1109 = vperm.xlu0 %1239, %v1398_v2  }
  0x96   :  { %787 = vperm.xlu1 %1229, %v1393_v1  }
  0x97   :  { %1136 = vperm.xlu0 %1239, %v1405_v3  }
  0x9a   :  { %791 = vperm.xlu1 %1229, %v1405_v3  }
  0x9e   :  { %1232 = vset.pattern.permute.xlu1 %v1328_v15  ;;  %v117_v15 = vsel %vm87_vm2, %v116_v58, %v115_v61  ;;  %v256_v61 = vrot.slane %v208_v46, 7 }
  0x9f   :  { %837 = vperm.xlu1 %1232, %v1410_v4  }
  0xa3   :  { %856 = vperm.xlu1 %1232, %v1393_v1  }
  0xa7   :  { %v97_v48 = vpop.permute.xlu1 %96  ;;  %1233 = vset.pattern.permute.xlu1 %v1329_v16  ;;  %v69_v49 = vpop.permute.xlu0 %68  ;;  %v199_v16 = vld [vmem:[#allocation2 + $0x2] sm:$0x1] }
  0xa8   :  { %902 = vperm.xlu1 %1233, %v1398_v2   ;;  %v90_v63 = vmul.f32 %v88_v53, %v69_v49  ;;  %v224_v35 = vsel %vm81_vm0, %v223_v14, %v199_v16  ;;  %v126_v37 = vmul.f32 %v117_v15, %v97_v48  ;;  %v270_v14 = vld [vmem:[#allocation2 + $0x23] sm:$0x1] }
  0xa9   :  { %v226_v48 = vsel %vm84_vm1, %v225_v36, %v224_v35  ;;  %v294_v29 = vrot.slane %v270_v14, 6  ;;  %v272_v36 = vld [vmem:[#allocation5 + $0x3] sm:$0x1]  ;;  %v1100_v14 = vld [vmem:[#allocation5 + $0xf] sm:$0x1] }
  0xaa   :  { %v92_v26 = vadd.f32 %v90_v63, %v49_v10  ;;  %v207_v63 = vld [vmem:[#allocation5 + $0x42] sm:$0x1] }
  0xab   :  { %v102_v5 = vpop.permute.xlu1 %101  ;;  %v74_v6 = vpop.permute.xlu0 %73  ;;  %v257_v12 = vsel %vm81_vm0, %v256_v61, %v207_v63  ;;  %v341_v63 = vld [vmem:[#allocation5 + $0x4] sm:$0x1] }
  0xac   :  { %v91_v11 = vmul.f32 %v88_v53, %v74_v6  ;;  %925 = vperm.xlu1 %1233, %v1393_v1   ;;  %v127_v21 = vmul.f32 %v123_v0, %v102_v5  ;;  %v128_v47 = vadd.f32 %v126_v37, %v92_v26  ;;  %v191_v53 = vrot.slane %v141_v40, 5  ;;  %v269_v6 = vld [vmem:[#allocation2 + $0x13] sm:$0x1] }
  0xad   :  { %v254_v5 = vrot.slane %v206_v54, 5  ;;  %v292_v15 = vrot.slane %v269_v6, 7  ;;  %v259_v26 = vsel %vm84_vm1, %v258_v9, %v257_v12  ;;  %v1101_v6 = vld [vmem:[#allocation5 + $0x1f] sm:$0x1]  ;;  %v1102_v9 = vld [vmem:[#allocation5 + $0x2f] sm:$0x1] }
  0xae   :  { %v93_v22 = vadd.f32 %v91_v11, %v49_v10  ;;  %v192_v10 = vsel %vm87_vm2, %v191_v53, %v190_v62  ;;  %v339_v53 = vld [vmem:[#allocation2 + $0x24] sm:$0x1] }
  0xaf   :  { %v255_v20 = vsel %vm87_vm2, %v254_v5, %v253_v7  ;;  %v363_v62 = vrot.slane %v339_v53, 6  ;;  %v344_v7 = vld [vmem:[#allocation5 + $0x34] sm:$0x1] }
  0xb0   :  { %v129_v30 = vadd.f32 %v127_v21, %v93_v22  ;;  %v148_v31 = vpop.permute.xlu1 %147  ;;  %929 = vperm.xlu1 %1233, %v1405_v3   ;;  %v144_v32 = vpop.permute.xlu0 %143  ;;  %v268_v21 = vld [vmem:[#allocation2 + $0x3] sm:$0x1]  ;;  %v260_v22 = vrot.slane %v210_v8, 5  ;;  %v390_v8 = vrot.slane %v343_v59, 6  ;;  %v345_v59 = vld [vmem:[#allocation5 + $0x44] sm:$0x1] }
  0xb1   :  { %v162_v38 = vmul.f32 %v159_v23, %v148_v31  ;;  %v161_v39 = vmul.f32 %v159_v23, %v144_v32  ;;  %v273_v23 = vld [vmem:[#allocation5 + $0x13] sm:$0x1]  ;;  %v293_v32 = vsel %vm81_vm0, %v292_v15, %v268_v21  ;;  %v1103_v15 = vld [vmem:[#allocation5 + $0x3f] sm:$0x1] }
  0xb2   :  { %v319_v34 = vrot.slane %v273_v23, 7  ;;  %v261_v35 = vsel %vm87_vm2, %v260_v22, %v259_v26  ;;  %v295_v40 = vsel %vm84_vm1, %v294_v29, %v293_v32  ;;  %v1151_v22 = vrot.slane %v1103_v15, 5 }
  0xb3   :  { %v164_v49 = vadd.f32 %v162_v38, %v129_v30  ;;  %v163_v56 = vadd.f32 %v161_v39, %v128_v47  ;;  %v296_v39 = vrot.slane %v271_v28, 5  ;;  %v392_v23 = vrot.slane %v344_v7, 5  ;;  %v411_v7 = vld [vmem:[#allocation5 + $0x15] sm:$0x1] }
  0xb4   :  { %v167_v52 = vpop.permute.xlu1 %166  ;;  %1236 = vset.pattern.permute.xlu1 %v1330_v17  ;;  %v171_v58 = vpop.permute.xlu0 %170  ;;  %v228_v17 = vsel %vm87_vm2, %v227_v51, %v226_v48  ;;  %v323_v51 = vrot.slane %v275_v41, 5  ;;  %v361_v48 = vrot.slane %v338_v45, 7  ;;  %v407_v45 = vld [vmem:[#allocation2 + $0x15] sm:$0x1] }
  0xb5   :  { %v195_v57 = vmul.f32 %v186_v43, %v167_v52  ;;  %975 = vperm.xlu1 %1236, %v1410_v4   ;;  %v196_v24 = vmul.f32 %v192_v10, %v171_v58  ;;  %v297_v46 = vsel %vm87_vm2, %v296_v39, %v295_v40  ;;  %v1147_v10 = vrot.slane %v1101_v6, 7  ;;  %v277_v40 = vld [vmem:[#allocation5 + $0x53] sm:$0x1] }
  0xb7   :  { %v197_v0 = vadd.f32 %v195_v57, %v163_v56  ;;  %v198_v37 = vadd.f32 %v196_v24, %v164_v49  ;;  %v342_v49 = vld [vmem:[#allocation5 + $0x14] sm:$0x1]  ;;  %v1148_v21 = vsel %vm81_vm0, %v1147_v10, %v1100_v14  ;;  %v476_v14 = vld [vmem:[#allocation2 + $0x16] sm:$0x1] }
  0xb8   :  { %v340_v56 = vld [vmem:[#allocation2 + $0x34] sm:$0x1]  ;;  %v388_v60 = vrot.slane %v342_v49, 7  ;;  %v415_v49 = vld [vmem:[#allocation5 + $0x55] sm:$0x1] }
  0xb9   :  { %994 = vperm.xlu1 %1236, %v1393_v1   ;;  %v213_v11 = vpop.permute.xlu1 %212  ;;  %v217_v16 = vpop.permute.xlu0 %216  ;;  %v365_v5 = vrot.slane %v340_v56, 5  ;;  %v430_v56 = vrot.slane %v407_v45, 7 }
  0xba   :  { %v230_v13 = vmul.f32 %v228_v17, %v213_v11  ;;  %v231_v30 = vmul.f32 %v228_v17, %v217_v16  ;;  %v362_v17 = vsel %vm81_vm0, %v361_v48, %v337_v55  ;;  %v1149_v16 = vrot.slane %v1102_v9, 6  ;;  %v406_v55 = vld [vmem:[#allocation2 + $0x5] sm:$0x1] }
  0xbb   :  { %v431_v15 = vsel %vm81_vm0, %v430_v56, %v406_v55  ;;  %v479_v55 = vld [vmem:[#allocation5 + $0x6] sm:$0x1] }
  0xbc   :  { %v232_v25 = vadd.f32 %v230_v13, %v197_v0  ;;  %v233_v43 = vadd.f32 %v231_v30, %v198_v37  ;;  %v389_v13 = vsel %vm81_vm0, %v388_v60, %v341_v63  ;;  %v348_v60 = vld [vmem:[#allocation5 + $0x74] sm:$0x1]  ;;  %v416_v63 = vld [vmem:[#allocation5 + $0x65] sm:$0x1] }
  0xbd   :  { %1237 = vset.pattern.permute.xlu1 %v1331_v18  ;;  %v236_v27 = vpop.permute.xlu1 %235  ;;  %v391_v24 = vsel %vm84_vm1, %v390_v8, %v389_v13  ;;  %v1561_v8 = vld [vmem:[#allocation5 + $0x25] sm:$0x1]  ;;  %v1567_v13 = vld [vmem:[#allocation5 + $0x35] sm:$0x1] }
  0xbe   :  { %v264_v31 = vmul.f32 %v255_v20, %v236_v27  ;;  %1040 = vperm.xlu1 %1237, %v1398_v2   ;;  %v320_v2 = vsel %vm81_vm0, %v319_v34, %v272_v36  ;;  %v282_v47 = vpop.permute.xlu0 %281  ;;  %v364_v20 = vsel %vm84_vm1, %v363_v62, %v362_v17  ;;  %v393_v29 = vsel %vm87_vm2, %v392_v23, %v391_v24  ;;  %v417_v17 = vld [vmem:[#allocation5 + $0x75] sm:$0x1] }
  0xbf   :  { %v322_v52 = vsel %vm84_vm1, %v321_v42, %v320_v2  ;;  %v299_v57 = vmul.f32 %v297_v46, %v282_v47  ;;  %v1524_v26 = vsel %vm87_vm2, %v365_v5, %v364_v20  ;;  %v278_v42 = vld [vmem:[#allocation5 + $0x63] sm:$0x1]  ;;  %v279_v2 = vld [vmem:[#allocation5 + $0x73] sm:$0x1]  ;;  %v346_v47 = vld [vmem:[#allocation5 + $0x54] sm:$0x1] }
  0xc0   :  { %v266_v38 = vadd.f32 %v264_v31, %v232_v25  ;;  %v324_v61 = vsel %vm87_vm2, %v323_v51, %v322_v52  ;;  %v1150_v25 = vsel %vm84_vm1, %v1149_v16, %v1148_v21  ;;  %v1552_v51 = vld [vmem:[#allocation2 + $0x35] sm:$0x1]  ;;  %v329_v48 = vrot.slane %v279_v2, 5 }
  0xc1   :  { %v240_v18 = vpop.permute.xlu1 %239  ;;  %v1528_v27 = vsel %vm87_vm2, %v1151_v22, %v1150_v25  ;;  %v434_v62 = vrot.slane %v1552_v51, 5  ;;  %v463_v5 = vrot.slane %v415_v49, 7  ;;  %v465_v20 = vrot.slane %v416_v63, 6  ;;  %v1571_v22 = vld [vmem:[#allocation2 + $0x26] sm:$0x1] }
  0xc2   :  { %v265_v44 = vmul.f32 %v261_v35, %v240_v18  ;;  %1063 = vperm.xlu1 %1237, %v1393_v1   ;;  %v301_v11 = vadd.f32 %v299_v57, %v266_v38  ;;  %v1548_v18 = vpop.permute.xlu0 %308  ;;  %v347_v57 = vld [vmem:[#allocation5 + $0x64] sm:$0x1]  ;;  %v467_v21 = vrot.slane %v417_v17, 5  ;;  %v457_v25 = vrot.slane %v411_v7, 7  ;;  %v546_v51 = vld [vmem:[#allocation2 + $0x27] sm:$0x1] }
  0xc3   :  { %v484_v49 = vld [vmem:[#allocation5 + $0x56] sm:$0x1]  ;;  %v553_v63 = vld [vmem:[#allocation5 + $0x57] sm:$0x1] }
  0xc4   :  { %v267_v50 = vadd.f32 %v265_v44, %v233_v43  ;;  %v325_v43 = vrot.slane %v277_v40, 7  ;;  %v276_v44 = vld [vmem:[#allocation5 + $0x43] sm:$0x1]  ;;  %v499_v40 = vrot.slane %v476_v14, 7 }
  0xc6   :  { %1067 = vperm.xlu1 %1237, %v1405_v3   ;;  %v286_v54 = vpop.permute.xlu1 %285  ;;  %v326_v53 = vsel %vm81_vm0, %v325_v43, %v276_v44  ;;  %v545_v43 = vld [vmem:[#allocation2 + $0x17] sm:$0x1] }
  0xc7   :  { %v300_v58 = vmul.f32 %v297_v46, %v286_v54  ;;  %v408_v46 = vld [vmem:[#allocation2 + $0x25] sm:$0x1]  ;;  %v1557_v54 = vpop.permute.xlu0 %354 }
  0xc9   :  { %v1513_v0 = vadd.f32 %v300_v58, %v267_v50  ;;  %v327_v50 = vrot.slane %v278_v42, 6  ;;  %v432_v58 = vrot.slane %v408_v46, 6  ;;  %v1581_v42 = vld [vmem:[#allocation5 + $0x36] sm:$0x1] }
  0xca   :  { %1240 = vset.pattern.permute.xlu1 %v1332_v19  ;;  %v305_v3 = vpop.permute.xlu1 %304 }
  0xcb   :  { %v333_v12 = vmul.f32 %v324_v61, %v305_v3  ;;  %1113 = vperm.xlu1 %1240, %v1410_v4   ;;  %v394_v61 = vrot.slane %v346_v47, 7  ;;  %v328_v6 = vsel %vm84_vm1, %v327_v50, %v326_v53  ;;  %v414_v3 = vld [vmem:[#allocation5 + $0x45] sm:$0x1]  ;;  %v433_v2 = vsel %vm84_vm1, %v432_v58, %v431_v15  ;;  %v483_v15 = vld [vmem:[#allocation5 + $0x46] sm:$0x1] }
  0xcc   :  { %v1565_v10 = vpop.permute.xlu0 %419  ;;  %v330_v23 = vsel %vm87_vm2, %v329_v48, %v328_v6  ;;  %v464_v24 = vsel %vm81_vm0, %v463_v5, %v414_v3  ;;  %v501_v47 = vrot.slane %v1571_v22, 6  ;;  %v1598_v17 = vsel %vm87_vm2, %v434_v62, %v433_v2  ;;  %v485_v6 = vld [vmem:[#allocation5 + $0x66] sm:$0x1]  ;;  %v1600_v3 = vld [vmem:[#allocation5 + $0x76] sm:$0x1] }
  0xcd   :  { %v335_v19 = vadd.f32 %v333_v12, %v301_v11  ;;  %v396_v11 = vrot.slane %v347_v57, 6  ;;  %v398_v12 = vrot.slane %v348_v60, 5  ;;  %v395_v16 = vsel %vm81_vm0, %v394_v61, %v345_v59  ;;  %v544_v59 = vld [vmem:[#allocation2 + $0x7] sm:$0x1]  ;;  %v1595_v60 = vld [vmem:[#allocation2 + $0x37] sm:$0x1] }
  0xce   :  { %v334_v53 = vmul.f32 %v330_v23, %v1548_v18  ;;  %v466_v48 = vsel %vm84_vm1, %v465_v20, %v464_v24  ;;  %v568_v61 = vrot.slane %v545_v43, 7  ;;  %v570_v5 = vrot.slane %v546_v51, 6  ;;  %v549_v20 = vld [vmem:[#allocation5 + $0x17] sm:$0x1]  ;;  %v552_v43 = vld [vmem:[#allocation5 + $0x47] sm:$0x1] }
  0xcf   :  { %1132 = vperm.xlu1 %1240, %v1393_v1   ;;  %v351_v4 = vpop.permute.xlu1 %350  ;;  %v397_v45 = vsel %vm84_vm1, %v396_v11, %v395_v16  ;;  %v532_v18 = vrot.slane %v484_v49, 7  ;;  %v554_v16 = vld [vmem:[#allocation5 + $0x67] sm:$0x1]  ;;  %v369_v23 = vmul.f32 %v1524_v26, %v1557_v54  ;;  %v1617_v2 = vld [vmem:[#allocation5 + $0x77] sm:$0x1]  ;;  %v595_v49 = vrot.slane %v549_v20, 7 }
  0xd0   :  { %v368_v28 = vmul.f32 %v1524_v26, %v351_v4  ;;  %v459_v4 = vrot.slane %v1561_v8, 6  ;;  %v1587_v46 = vpop.permute.xlu0 %446  ;;  %v399_v7 = vsel %vm87_vm2, %v398_v12, %v397_v45  ;;  %v468_v8 = vsel %vm87_vm2, %v467_v21, %v466_v48  ;;  %v614_v12 = vld [vmem:[#allocation2 + $0x18] sm:$0x1]  ;;  %v548_v45 = vld [vmem:[#allocation5 + $0x7] sm:$0x1] }
  0xd1   :  { %v336_v62 = vadd.f32 %v334_v53, %v1513_v0  ;;  %v533_v26 = vsel %vm81_vm0, %v532_v18, %v483_v15  ;;  %v603_v54 = vrot.slane %v554_v16, 6  ;;  %v550_v51 = vld [vmem:[#allocation5 + $0x27] sm:$0x1]  ;;  %v551_v15 = vld [vmem:[#allocation5 + $0x37] sm:$0x1] }
  0xd2   :  { %v370_v30 = vadd.f32 %v368_v28, %v335_v19  ;;  %v1573_v19 = vld [vmem:[#allocation2 + $0x36] sm:$0x1]  ;;  %v613_v16 = vld [vmem:[#allocation2 + $0x8] sm:$0x1]  ;;  %v622_v24 = vld [vmem:[#allocation5 + $0x58] sm:$0x1] }
  0xd3   :  { %v374_v31 = vpop.permute.xlu1 %373  ;;  %v480_v28 = vld [vmem:[#allocation5 + $0x16] sm:$0x1]  ;;  %v503_v50 = vrot.slane %v1573_v19, 5  ;;  %v617_v20 = vld [vmem:[#allocation5 + $0x8] sm:$0x1] }
  0xd4   :  { %v402_v32 = vmul.f32 %v393_v29, %v374_v31  ;;  %v1578_v29 = vld [vmem:[#allocation5 + $0x26] sm:$0x1]  ;;  %v461_v31 = vrot.slane %v1567_v13, 5  ;;  %v526_v56 = vrot.slane %v480_v28, 7  ;;  %v601_v28 = vrot.slane %v553_v63, 7 }
  0xd5   :  { %v528_v57 = vrot.slane %v1578_v29, 6  ;;  %v618_v29 = vld [vmem:[#allocation5 + $0x18] sm:$0x1]  ;;  %v1612_v21 = vpop.permute.xlu0 %492  ;;  %v691_v58 = vld [vmem:[#allocation5 + $0x59] sm:$0x1] }
  0xd6   :  { %v1532_v33 = vadd.f32 %v402_v32, %v370_v30  ;;  %v410_v30 = vld [vmem:[#allocation5 + $0x5] sm:$0x1]  ;;  %v475_v32 = vld [vmem:[#allocation2 + $0x6] sm:$0x1]  ;;  %v1659_v19 = vld [vmem:[#allocation2 + $0x39] sm:$0x1] }
  0xd7   :  { %v1534_v34 = vpop.permute.xlu1 %377  ;;  %v458_v11 = vsel %vm81_vm0, %v457_v25, %v410_v30  ;;  %v500_v14 = vsel %vm81_vm0, %v499_v40, %v475_v32  ;;  %v527_v25 = vsel %vm81_vm0, %v526_v56, %v479_v55  ;;  %v569_v30 = vsel %vm81_vm0, %v568_v61, %v544_v59  ;;  %v615_v55 = vld [vmem:[#allocation2 + $0x28] sm:$0x1] }
  0xd8   :  { %v534_v32 = vrot.slane %v485_v6, 6  ;;  %v403_v0 = vmul.f32 %v399_v7, %v1534_v34  ;;  %v460_v53 = vsel %vm84_vm1, %v459_v4, %v458_v11  ;;  %v502_v48 = vsel %vm84_vm1, %v501_v47, %v500_v14  ;;  %v619_v59 = vld [vmem:[#allocation5 + $0x28] sm:$0x1] }
  0xd9   :  { %v637_v56 = vrot.slane %v614_v12, 7  ;;  %v664_v61 = vrot.slane %v618_v29, 7  ;;  %v371_v6 = vadd.f32 %v369_v23, %v336_v62  ;;  %v529_v18 = vsel %vm84_vm1, %v528_v57, %v527_v25  ;;  %v616_v62 = vld [vmem:[#allocation2 + $0x38] sm:$0x1] }
  0xda   :  { %v602_v7 = vsel %vm81_vm0, %v601_v28, %v552_v43  ;;  %v571_v4 = vsel %vm84_vm1, %v570_v5, %v569_v30  ;;  %v1630_v47 = vpop.permute.xlu0 %557  ;;  %v535_v11 = vsel %vm84_vm1, %v534_v32, %v533_v26  ;;  %v605_v14 = vrot.slane %v1617_v2, 5  ;;  %v620_v23 = vld [vmem:[#allocation5 + $0x38] sm:$0x1]  ;;  %v683_v30 = vld [vmem:[#allocation2 + $0x19] sm:$0x1] }
  0xdb   :  { %v597_v12 = vrot.slane %v550_v51, 6  ;;  %v405_v29 = vadd.f32 %v403_v0, %v371_v6  ;;  %v639_v57 = vrot.slane %v615_v55, 6  ;;  %v666_v25 = vrot.slane %v619_v59, 6  ;;  %v684_v59 = vld [vmem:[#allocation2 + $0x29] sm:$0x1] }
  0xdc   :  { %v1536_v35 = vpop.permute.xlu1 %423  ;;  %v604_v28 = vsel %vm84_vm1, %v603_v54, %v602_v7  ;;  %v599_v43 = vrot.slane %v551_v15, 5  ;;  %v638_v40 = vsel %vm81_vm0, %v637_v56, %v613_v16  ;;  %v665_v5 = vsel %vm81_vm0, %v664_v61, %v617_v20  ;;  %v682_v56 = vld [vmem:[#allocation2 + $0x9] sm:$0x1]  ;;  %v687_v61 = vld [vmem:[#allocation5 + $0x19] sm:$0x1] }
  0xdd   :  { %v438_v34 = vmul.f32 %v1598_v17, %v1536_v35  ;;  %v596_v35 = vsel %vm81_vm0, %v595_v49, %v548_v45  ;;  %v472_v2 = vmul.f32 %v468_v8, %v1587_v46  ;;  %v641_v26 = vrot.slane %v616_v62, 5  ;;  %v692_v16 = vld [vmem:[#allocation5 + $0x69] sm:$0x1] }
  0xde   :  { %v668_v51 = vrot.slane %v620_v23, 5  ;;  %v462_v45 = vsel %vm87_vm2, %v461_v31, %v460_v53  ;;  %v1647_v54 = vsel %vm87_vm2, %v503_v50, %v502_v48  ;;  %v1837_v49 = vrot.slane %v1581_v42, 5  ;;  %v1654_v46 = vpop.permute.xlu0 %584  ;;  %v621_v53 = vld [vmem:[#allocation5 + $0x48] sm:$0x1] }
  0xdf   :  { %v440_v32 = vadd.f32 %v438_v34, %v405_v29  ;;  %v598_v8 = vsel %vm84_vm1, %v597_v12, %v596_v35  ;;  %v640_v13 = vsel %vm84_vm1, %v639_v57, %v638_v40  ;;  %v667_v31 = vsel %vm84_vm1, %v666_v25, %v665_v5  ;;  %v623_v48 = vld [vmem:[#allocation5 + $0x68] sm:$0x1]  ;;  %v690_v40 = vld [vmem:[#allocation5 + $0x49] sm:$0x1]  ;;  %v624_v25 = vld [vmem:[#allocation5 + $0x78] sm:$0x1] }
  0xe0   :  { %v1538_v36 = vpop.permute.xlu1 %442  ;;  %v1652_v55 = vsel %vm87_vm2, %v1837_v49, %v529_v18  ;;  %v706_v50 = vrot.slane %v683_v30, 7  ;;  %v670_v42 = vrot.slane %v622_v24, 7  ;;  %v1838_v6 = vrot.slane %v1595_v60, 5  ;;  %v688_v60 = vld [vmem:[#allocation5 + $0x29] sm:$0x1] }
  0xe1   :  { %v1839_v18 = vrot.slane %v1600_v3, 5  ;;  %v606_v15 = vsel %vm87_vm2, %v605_v14, %v604_v28  ;;  %v739_v20 = vrot.slane %v691_v58, 7  ;;  %v474_v12 = vadd.f32 %v472_v2, %v440_v32  ;;  %v686_v35 = vld [vmem:[#allocation5 + $0x9] sm:$0x1] }
  0xe2   :  { %v1664_v34 = vsel %vm87_vm2, %v1838_v6, %v571_v4  ;;  %v507_v62 = vmul.f32 %v1647_v54, %v1612_v21  ;;  %v1673_v24 = vsel %vm87_vm2, %v599_v43, %v598_v8  ;;  %v733_v23 = vrot.slane %v687_v61, 7  ;;  %v752_v4 = vld [vmem:[#allocation2 + $0x1a] sm:$0x1]  ;;  %v693_v43 = vld [vmem:[#allocation5 + $0x79] sm:$0x1] }
  0xe3   :  { %v537_v7 = vsel %vm87_vm2, %v1839_v18, %v535_v11  ;;  %v1678_v3 = vsel %vm87_vm2, %v641_v26, %v640_v13  ;;  %v1681_v11 = vsel %vm87_vm2, %v668_v51, %v667_v31  ;;  %v708_v14 = vrot.slane %v684_v59, 6  ;;  %v631_v30 = vpop.permute.xlu0 %630  ;;  %v753_v51 = vld [vmem:[#allocation2 + $0x2a] sm:$0x1]  ;;  %v756_v31 = vld [vmem:[#allocation5 + $0x1a] sm:$0x1] }
  0xe4   :  { %v672_v58 = vrot.slane %v623_v48, 6  ;;  %v707_v21 = vsel %vm81_vm0, %v706_v50, %v682_v56  ;;  %v671_v28 = vsel %vm81_vm0, %v670_v42, %v621_v53  ;;  %v741_v5 = vrot.slane %v692_v16, 6  ;;  %v689_v56 = vld [vmem:[#allocation5 + $0x39] sm:$0x1]  ;;  %v751_v13 = vld [vmem:[#allocation2 + $0xa] sm:$0x1] }
  0xe5   :  { %v1540_v1 = vpop.permute.xlu1 %488  ;;  %v710_v32 = vrot.slane %v1659_v19, 5  ;;  %v740_v2 = vsel %vm81_vm0, %v739_v20, %v690_v40  ;;  %v735_v26 = vrot.slane %v688_v60, 6  ;;  %v775_v49 = vrot.slane %v752_v4, 7  ;;  %v754_v18 = vld [vmem:[#allocation2 + $0x3a] sm:$0x1] }
  0xe6   :  { %v437_v8 = vmul.f32 %v1598_v17, %v1565_v10  ;;  %v509_v59 = vadd.f32 %v507_v62, %v474_v12  ;;  %v734_v61 = vsel %vm81_vm0, %v733_v23, %v686_v35  ;;  %v709_v19 = vsel %vm84_vm1, %v708_v14, %v707_v21  ;;  %v760_v60 = vld [vmem:[#allocation5 + $0x5a] sm:$0x1]  ;;  %v755_v14 = vld [vmem:[#allocation5 + $0xa] sm:$0x1] }
  0xe7   :  { %v673_v53 = vsel %vm84_vm1, %v672_v58, %v671_v28  ;;  %v674_v48 = vrot.slane %v624_v25, 5  ;;  %v743_v42 = vrot.slane %v693_v43, 5  ;;  %v471_v6 = vmul.f32 %v462_v45, %v1538_v36  ;;  %v757_v58 = vld [vmem:[#allocation5 + $0x2a] sm:$0x1]  ;;  %v822_v25 = vld [vmem:[#allocation2 + $0x2b] sm:$0x1] }
  0xe8   :  { %v742_v17 = vsel %vm84_vm1, %v741_v5, %v740_v2  ;;  %v1699_v40 = vpop.permute.xlu0 %695  ;;  %v736_v16 = vsel %vm84_vm1, %v735_v26, %v734_v61  ;;  %v737_v20 = vrot.slane %v689_v56, 5  ;;  %v776_v12 = vsel %vm81_vm0, %v775_v49, %v751_v13  ;;  %v829_v5 = vld [vmem:[#allocation5 + $0x5b] sm:$0x1]  ;;  %v758_v49 = vld [vmem:[#allocation5 + $0x3a] sm:$0x1] }
  0xe9   :  { %v1542_v37 = vpop.permute.xlu1 %511  ;;  %v802_v62 = vrot.slane %v756_v31, 7  ;;  %v439_v23 = vadd.f32 %v437_v8, %v1532_v33  ;;  %v506_v36 = vmul.f32 %v1647_v54, %v1540_v1  ;;  %v610_v4 = vmul.f32 %v606_v15, %v1654_v46  ;;  %v820_v46 = vld [vmem:[#allocation2 + $0xb] sm:$0x1]  ;;  %v761_v15 = vld [vmem:[#allocation5 + $0x6a] sm:$0x1] }
  0xea   :  { %v1708_v35 = vsel %vm87_vm2, %v710_v32, %v709_v19  ;;  %v779_v21 = vrot.slane %v754_v18, 5  ;;  %v540_v1 = vmul.f32 %v1652_v55, %v1542_v37  ;;  %v808_v2 = vrot.slane %v760_v60, 7  ;;  %v830_v55 = vld [vmem:[#allocation5 + $0x6b] sm:$0x1]  ;;  %v825_v31 = vld [vmem:[#allocation5 + $0x1b] sm:$0x1] }
  0xeb   :  { %v473_v33 = vadd.f32 %v471_v6, %v439_v23  ;;  %v744_v32 = vsel %vm87_vm2, %v743_v42, %v742_v17  ;;  %v803_v8 = vsel %vm81_vm0, %v802_v62, %v755_v14  ;;  %v645_v37 = vmul.f32 %v1678_v3, %v631_v30  ;;  %v828_v6 = vld [vmem:[#allocation5 + $0x4b] sm:$0x1]  ;;  %v823_v30 = vld [vmem:[#allocation2 + $0x3b] sm:$0x1]  ;;  %v890_v14 = vld [vmem:[#allocation2 + $0x1c] sm:$0x1] }
  0xec   :  { %v723_v26 = vpop.permute.xlu0 %722  ;;  %v877_v13 = vrot.slane %v829_v5, 7  ;;  %v810_v42 = vrot.slane %v761_v15, 6  ;;  %v575_v18 = vmul.f32 %v1664_v34, %v1630_v47  ;;  %v879_v62 = vrot.slane %v830_v55, 6  ;;  %v826_v60 = vld [vmem:[#allocation5 + $0x2b] sm:$0x1] }
  0xed   :  { %v1544_v38 = vpop.permute.xlu1 %515  ;;  %v508_v56 = vadd.f32 %v506_v36, %v473_v33  ;;  %v871_v23 = vrot.slane %v825_v31, 7  ;;  %v831_v47 = vld [vmem:[#allocation5 + $0x7b] sm:$0x1] }
  0xee   :  { %v541_v57 = vmul.f32 %v537_v7, %v1544_v38  ;;  %v821_v7 = vld [vmem:[#allocation2 + $0x1b] sm:$0x1] }
  0xef   :  { %v844_v28 = vrot.slane %v821_v7, 7  ;;  %v542_v17 = vadd.f32 %v540_v1, %v508_v56  ;;  %v762_v7 = vld [vmem:[#allocation5 + $0x7a] sm:$0x1]  ;;  %v827_v33 = vld [vmem:[#allocation5 + $0x3b] sm:$0x1]  ;;  %v873_v1 = vrot.slane %v826_v60, 6  ;;  %v713_v60 = vmul.f32 %v1708_v35, %v1699_v40 }
  0xf0   :  { %v543_v10 = vadd.f32 %v541_v57, %v509_v59  ;;  %v675_v57 = vsel %vm87_vm2, %v674_v48, %v673_v53  ;;  %v804_v59 = vrot.slane %v757_v58, 6  ;;  %v846_v48 = vrot.slane %v822_v25, 6 }
  0xf1   :  { %v845_v53 = vsel %vm81_vm0, %v844_v28, %v820_v46  ;;  %v769_v58 = vpop.permute.xlu0 %768  ;;  %v812_v28 = vrot.slane %v762_v7, 5  ;;  %v577_v5 = vadd.f32 %v575_v18, %v542_v17  ;;  %v881_v46 = vrot.slane %v831_v47, 5  ;;  %v967_v18 = vld [vmem:[#allocation5 + $0x5d] sm:$0x1]  ;;  %v893_v7 = vld [vmem:[#allocation5 + $0xc] sm:$0x1] }
  0xf2   :  { %v1546_v39 = vpop.permute.xlu1 %561  ;;  %v899_v47 = vld [vmem:[#allocation5 + $0x6c] sm:$0x1] }
  0xf3   :  { %v576_v38 = vmul.f32 %v1664_v34, %v1546_v39  ;;  %v777_v39 = vrot.slane %v753_v51, 6  ;;  %v1718_v51 = vsel %vm87_vm2, %v737_v20, %v736_v16  ;;  %v805_v20 = vsel %vm84_vm1, %v804_v59, %v803_v8  ;;  %v824_v34 = vld [vmem:[#allocation5 + $0xb] sm:$0x1]  ;;  %v894_v8 = vld [vmem:[#allocation5 + $0x1c] sm:$0x1] }
  0xf4   :  { %v872_v15 = vsel %vm81_vm0, %v871_v23, %v824_v34 }
  0xf5   :  { %v578_v45 = vadd.f32 %v576_v38, %v543_v10  ;;  %v778_v54 = vsel %vm84_vm1, %v777_v39, %v776_v12  ;;  %v759_v38 = vld [vmem:[#allocation5 + $0x4a] sm:$0x1]  ;;  %v806_v12 = vrot.slane %v758_v49, 5  ;;  %v913_v49 = vrot.slane %v890_v14, 7 }
  0xf6   :  { %v1550_v41 = vpop.permute.xlu1 %580  ;;  %v1723_v19 = vsel %vm87_vm2, %v779_v21, %v778_v54  ;;  %v809_v16 = vsel %vm81_vm0, %v808_v2, %v759_v38  ;;  %v848_v21 = vrot.slane %v823_v30, 5  ;;  %v891_v2 = vld [vmem:[#allocation2 + $0x2c] sm:$0x1]  ;;  %v1752_v31 = vpop.permute.xlu0 %833 }
  0xf7   :  { %v612_v61 = vadd.f32 %v610_v4, %v578_v45  ;;  %v609_v36 = vmul.f32 %v1673_v24, %v1550_v41  ;;  %v811_v25 = vsel %vm84_vm1, %v810_v42, %v809_v16  ;;  %v807_v55 = vsel %vm87_vm2, %v806_v12, %v805_v20  ;;  %v1755_v42 = vld [vmem:[#allocation2 + $0x3c] sm:$0x1]  ;;  %v960_v16 = vld [vmem:[#allocation2 + $0x2d] sm:$0x1] }
  0xf8   :  { %v917_v14 = vrot.slane %v1755_v42, 5 }
  0xf9   :  { %v647_v45 = vadd.f32 %v645_v37, %v612_v61  ;;  %v611_v59 = vadd.f32 %v609_v36, %v577_v5  ;;  %v748_v61 = vmul.f32 %v744_v32, %v723_v26  ;;  %v898_v37 = vld [vmem:[#allocation5 + $0x5c] sm:$0x1]  ;;  %v895_v32 = vld [vmem:[#allocation5 + $0x2c] sm:$0x1]  ;;  %v940_v26 = vrot.slane %v894_v8, 7 }
  0xfa   :  { %v946_v12 = vrot.slane %v898_v37, 7  ;;  %v783_v36 = vmul.f32 %v1723_v19, %v769_v58  ;;  %v900_v8 = vld [vmem:[#allocation5 + $0x7c] sm:$0x1] }
  0xfb   :  { %v1554_v52 = vpop.permute.xlu1 %626  ;;  %v941_v58 = vsel %vm81_vm0, %v940_v26, %v893_v7  ;;  %v962_v26 = vld [vmem:[#allocation5 + $0xd] sm:$0x1] }
  0xfc   :  { %v644_v41 = vmul.f32 %v1678_v3, %v1554_v52  ;;  %v889_v52 = vld [vmem:[#allocation2 + $0xc] sm:$0x1]  ;;  %v959_v3 = vld [vmem:[#allocation2 + $0x1d] sm:$0x1] }
  0xfd   :  { %v914_v30 = vsel %vm81_vm0, %v913_v49, %v889_v52  ;;  %v982_v20 = vrot.slane %v959_v3, 7  ;;  %v961_v49 = vld [vmem:[#allocation2 + $0x3d] sm:$0x1] }
  0xff   :  { %v1563_v9 = vpop.permute.xlu1 %649 }
 0x100   :  { %v678_v38 = vmul.f32 %v1681_v11, %v1563_v9  ;;  %v874_v9 = vsel %vm84_vm1, %v873_v1, %v872_v15  ;;  %v915_v11 = vrot.slane %v891_v2, 6  ;;  %v984_v1 = vrot.slane %v960_v16, 6  ;;  %v963_v15 = vld [vmem:[#allocation5 + $0x1d] sm:$0x1] }
 0x101   :  { %v1009_v42 = vrot.slane %v963_v15, 7 }
 0x102   :  { %v916_v40 = vsel %vm84_vm1, %v915_v11, %v914_v30  ;;  %v950_v11 = vrot.slane %v900_v8, 5  ;;  %v1030_v8 = vld [vmem:[#allocation2 + $0x3e] sm:$0x1] }
 0x103   :  { %v1583_v44 = vpop.permute.xlu1 %653 }
 0x104   :  { %v679_v39 = vmul.f32 %v675_v57, %v1583_v44  ;;  %v878_v44 = vsel %vm81_vm0, %v877_v13, %v828_v6  ;;  %v847_v57 = vsel %vm84_vm1, %v846_v48, %v845_v53  ;;  %v813_v53 = vsel %vm87_vm2, %v812_v28, %v811_v25 }
 0x105   :  { %v880_v54 = vsel %vm84_vm1, %v879_v62, %v878_v44  ;;  %v1750_v13 = vsel %vm87_vm2, %v848_v21, %v847_v57  ;;  %v875_v48 = vrot.slane %v827_v33, 5  ;;  %v646_v6 = vadd.f32 %v644_v41, %v611_v59  ;;  %v861_v44 = vpop.permute.xlu0 %860  ;;  %v966_v41 = vld [vmem:[#allocation5 + $0x4d] sm:$0x1] }
 0x106   :  { %v681_v24 = vadd.f32 %v679_v39, %v647_v45  ;;  %v882_v39 = vsel %vm87_vm2, %v881_v46, %v880_v54  ;;  %v958_v45 = vld [vmem:[#allocation2 + $0xd] sm:$0x1]  ;;  %v942_v57 = vrot.slane %v895_v32, 6  ;;  %v1015_v21 = vrot.slane %v967_v18, 7 }
 0x107   :  { %v680_v62 = vadd.f32 %v678_v38, %v646_v6  ;;  %v1766_v34 = vsel %vm87_vm2, %v875_v48, %v874_v9  ;;  %v983_v33 = vsel %vm81_vm0, %v982_v20, %v958_v45  ;;  %v948_v46 = vrot.slane %v899_v47, 6  ;;  %v964_v48 = vld [vmem:[#allocation5 + $0x2d] sm:$0x1]  ;;  %v1028_v6 = vld [vmem:[#allocation2 + $0x1e] sm:$0x1] }
 0x108   :  { %v1606_v22 = vpop.permute.xlu1 %699  ;;  %v943_v59 = vsel %vm84_vm1, %v942_v57, %v941_v58  ;;  %v886_v7 = vmul.f32 %v882_v39, %v861_v44  ;;  %v1032_v20 = vld [vmem:[#allocation5 + $0x1e] sm:$0x1]  ;;  %v1010_v47 = vsel %vm81_vm0, %v1009_v42, %v962_v26  ;;  %v1027_v57 = vld [vmem:[#allocation2 + $0xe] sm:$0x1] }
 0x109   :  { %v714_v4 = vmul.f32 %v1708_v35, %v1606_v22  ;;  %v896_v35 = vld [vmem:[#allocation5 + $0x3c] sm:$0x1]  ;;  %v715_v2 = vadd.f32 %v713_v60, %v680_v62  ;;  %v1011_v62 = vrot.slane %v964_v48, 6  ;;  %v1051_v60 = vrot.slane %v1028_v6, 7  ;;  %v1029_v39 = vld [vmem:[#allocation2 + $0x2e] sm:$0x1] }
 0x10a   :  { %v944_v38 = vrot.slane %v896_v35, 5  ;;  %v1078_v35 = vrot.slane %v1032_v20, 7  ;;  %v1106_v20 = vld [vmem:[#allocation5 + $0x6f] sm:$0x1] }
 0x10b   :  { %v716_v56 = vadd.f32 %v714_v4, %v681_v24  ;;  %v897_v4 = vld [vmem:[#allocation5 + $0x4c] sm:$0x1]  ;;  %v968_v24 = vld [vmem:[#allocation5 + $0x6d] sm:$0x1] }
 0x10c   :  { %v1623_v63 = vpop.permute.xlu1 %718  ;;  %v947_v54 = vsel %vm81_vm0, %v946_v12, %v897_v4  ;;  %v1017_v52 = vrot.slane %v968_v24, 6  ;;  %v1036_v12 = vld [vmem:[#allocation5 + $0x5e] sm:$0x1]  ;;  %v945_v45 = vsel %vm87_vm2, %v944_v38, %v943_v59  ;;  %v965_v4 = vld [vmem:[#allocation5 + $0x3d] sm:$0x1] }
 0x10d   :  { %v750_v23 = vadd.f32 %v748_v61, %v716_v56  ;;  %v747_v25 = vmul.f32 %v1718_v51, %v1623_v63  ;;  %v969_v56 = vld [vmem:[#allocation5 + $0x7d] sm:$0x1]  ;;  %v1016_v61 = vsel %vm81_vm0, %v1015_v21, %v966_v41  ;;  %v949_v9 = vsel %vm84_vm1, %v948_v46, %v947_v54  ;;  %v1037_v54 = vld [vmem:[#allocation5 + $0x6e] sm:$0x1]  ;;  %v1034_v59 = vld [vmem:[#allocation5 + $0x3e] sm:$0x1] }
 0x10e   :  { %v1019_v16 = vrot.slane %v969_v56, 5  ;;  %v1084_v58 = vrot.slane %v1036_v12, 7  ;;  %v1012_v46 = vsel %vm84_vm1, %v1011_v62, %v1010_v47  ;;  %v1013_v15 = vrot.slane %v965_v4, 5  ;;  %v1098_v56 = vld [vmem:[#allocation2 + $0x2f] sm:$0x1] }
 0x10f   :  { %v785_v63 = vadd.f32 %v783_v36, %v750_v23  ;;  %v749_v3 = vadd.f32 %v747_v25, %v715_v2  ;;  %v851_v36 = vmul.f32 %v1750_v13, %v1752_v31  ;;  %v1052_v2 = vsel %vm81_vm0, %v1051_v60, %v1027_v57 }
 0x111   :  { %v1639_v0 = vpop.permute.xlu1 %764 }
 0x115   :  { %v1675_v29 = vpop.permute.xlu1 %787 }
 0x116   :  { %v816_v37 = vmul.f32 %v807_v55, %v1675_v29  ;;  %v918_v29 = vsel %vm87_vm2, %v917_v14, %v916_v40  ;;  %v1018_v55 = vsel %vm84_vm1, %v1017_v52, %v1016_v61  ;;  %v951_v14 = vsel %vm87_vm2, %v950_v11, %v949_v9  ;;  %v1033_v40 = vld [vmem:[#allocation5 + $0x2e] sm:$0x1] }
 0x117   :  { %v1020_v24 = vsel %vm87_vm2, %v1019_v16, %v1018_v55  ;;  %v1055_v9 = vrot.slane %v1030_v8, 5  ;;  %v1082_v11 = vrot.slane %v1034_v59, 5 }
 0x119   :  { %v1693_v50 = vpop.permute.xlu1 %791 }
 0x11a   :  { %v817_v28 = vmul.f32 %v813_v53, %v1693_v50  ;;  %v782_v50 = vmul.f32 %v1723_v19, %v1639_v0  ;;  %v907_v0 = vpop.permute.xlu0 %906  ;;  %v985_v19 = vsel %vm84_vm1, %v984_v1, %v983_v33  ;;  %v1097_v33 = vld [vmem:[#allocation2 + $0x1f] sm:$0x1]  ;;  %v1035_v1 = vld [vmem:[#allocation5 + $0x4e] sm:$0x1] }
 0x11b   :  { %v921_v31 = vmul.f32 %v918_v29, %v907_v0  ;;  %v1120_v61 = vrot.slane %v1097_v33, 7  ;;  %v1085_v52 = vsel %vm81_vm0, %v1084_v58, %v1035_v1  ;;  %v1038_v0 = vld [vmem:[#allocation5 + $0x7e] sm:$0x1] }
 0x11c   :  { %v819_v53 = vadd.f32 %v817_v28, %v785_v63  ;;  %v784_v18 = vadd.f32 %v782_v50, %v749_v3  ;;  %v1031_v28 = vld [vmem:[#allocation5 + $0xe] sm:$0x1]  ;;  %v1053_v63 = vrot.slane %v1029_v39, 6  ;;  %v1086_v3 = vrot.slane %v1037_v54, 6 }
 0x11d   :  { %v1079_v38 = vsel %vm81_vm0, %v1078_v35, %v1031_v28  ;;  %v1155_v28 = vrot.slane %v1106_v20, 6 }
 0x11e   :  { %v1711_v43 = vpop.permute.xlu1 %837  ;;  %v818_v23 = vadd.f32 %v816_v37, %v784_v18  ;;  %v972_v21 = vpop.permute.xlu0 %971 }
 0x11f   :  { %v852_v51 = vmul.f32 %v1750_v13, %v1711_v43  ;;  %v986_v43 = vrot.slane %v961_v49, 5 }
 0x120   :  { %v853_v50 = vadd.f32 %v851_v36, %v818_v23  ;;  %v1099_v36 = vld [vmem:[#allocation2 + $0x3f] sm:$0x1] }
 0x121   :  { %v854_v30 = vadd.f32 %v852_v51, %v819_v53  ;;  %v987_v44 = vsel %vm87_vm2, %v986_v43, %v985_v19  ;;  %v1014_v19 = vsel %vm87_vm2, %v1013_v15, %v1012_v46  ;;  %v1054_v43 = vsel %vm84_vm1, %v1053_v63, %v1052_v2 }
 0x122   :  { %v1726_v10 = vpop.permute.xlu1 %856  ;;  %v989_v55 = vmul.f32 %v987_v44, %v972_v21  ;;  %v1056_v4 = vsel %vm87_vm2, %v1055_v9, %v1054_v43  ;;  %v1124_v35 = vrot.slane %v1099_v36, 5 }
 0x123   :  { %v888_v41 = vadd.f32 %v886_v7, %v854_v30  ;;  %v885_v13 = vmul.f32 %v1766_v34, %v1726_v10  ;;  %v1080_v10 = vrot.slane %v1033_v40, 6  ;;  %v999_v34 = vpop.permute.xlu0 %998  ;;  %v1122_v7 = vrot.slane %v1098_v56, 6 }
 0x124   :  { %v1024_v60 = vmul.f32 %v1020_v24, %v999_v34 }
 0x125   :  { %v887_v37 = vadd.f32 %v885_v13, %v853_v50  ;;  %v923_v53 = vadd.f32 %v921_v31, %v888_v41  ;;  %v1081_v30 = vsel %vm84_vm1, %v1080_v10, %v1079_v38 }
 0x126   :  { %v1083_v39 = vsel %vm87_vm2, %v1082_v11, %v1081_v30 }
 0x127   :  { %v1742_v22 = vpop.permute.xlu1 %902  ;;  %v1045_v47 = vpop.permute.xlu0 %1044 }
 0x128   :  { %v920_v51 = vmul.f32 %v918_v29, %v1742_v22  ;;  %v1096_v22 = vld [vmem:[#allocation2 + $0xf] sm:$0x1]  ;;  %v1059_v13 = vmul.f32 %v1056_v4, %v1045_v47 }
 0x129   :  { %v1121_v16 = vsel %vm81_vm0, %v1120_v61, %v1096_v22 }
 0x12a   :  { %v922_v26 = vadd.f32 %v920_v51, %v887_v37  ;;  %v1123_v40 = vsel %vm84_vm1, %v1122_v7, %v1121_v16 }
 0x12b   :  { %v1758_v17 = vpop.permute.xlu1 %925  ;;  %v1110_v33 = vpop.permute.xlu0 %1109  ;;  %v1125_v2 = vsel %vm87_vm2, %v1124_v35, %v1123_v40 }
 0x12c   :  { %v954_v48 = vmul.f32 %v945_v45, %v1758_v17  ;;  %v1087_v17 = vsel %vm84_vm1, %v1086_v3, %v1085_v52  ;;  %v1104_v45 = vld [vmem:[#allocation5 + $0x4f] sm:$0x1]  ;;  %v1127_v10 = vmul.f32 %v1125_v2, %v1110_v33 }
 0x12e   :  { %v956_v29 = vadd.f32 %v954_v48, %v922_v26 }
 0x12f   :  { %v1774_v5 = vpop.permute.xlu1 %929  ;;  %v1137_v8 = vpop.permute.xlu0 %1136 }
 0x130   :  { %v955_v49 = vmul.f32 %v951_v14, %v1774_v5  ;;  %v1105_v5 = vld [vmem:[#allocation5 + $0x5f] sm:$0x1]  ;;  %v991_v21 = vadd.f32 %v989_v55, %v956_v29 }
 0x131   :  { %v1153_v12 = vrot.slane %v1105_v5, 7  ;;  %v1107_v14 = vld [vmem:[#allocation5 + $0x7f] sm:$0x1] }
 0x132   :  { %v957_v18 = vadd.f32 %v955_v49, %v923_v53  ;;  %v1157_v1 = vrot.slane %v1107_v14, 5 }
 0x134   :  { %v976_v32 = vpop.permute.xlu1 %975 }
 0x135   :  { %v990_v42 = vmul.f32 %v987_v44, %v976_v32  ;;  %v1088_v32 = vrot.slane %v1038_v0, 5  ;;  %v1154_v44 = vsel %vm81_vm0, %v1153_v12, %v1104_v45 }
 0x136   :  { %v1156_v15 = vsel %vm84_vm1, %v1155_v28, %v1154_v44 }
 0x137   :  { %v992_v62 = vadd.f32 %v990_v42, %v957_v18  ;;  %v1089_v58 = vsel %vm87_vm2, %v1088_v32, %v1087_v17  ;;  %v1158_v49 = vsel %vm87_vm2, %v1157_v1, %v1156_v15 }
 0x138   :  { %v995_v25 = vpop.permute.xlu1 %994  ;;  %v1162_v61 = vmul.f32 %v1158_v49, %v1137_v8 }
 0x139   :  { %v1023_v57 = vmul.f32 %v1014_v19, %v995_v25  ;;  %v1026_v41 = vadd.f32 %v1024_v60, %v992_v62 }
 0x13b   :  { %v1025_v54 = vadd.f32 %v1023_v57, %v991_v21  ;;  %v1061_v63 = vadd.f32 %v1059_v13, %v1026_v41 }
 0x13d   :  { %v1041_v6 = vpop.permute.xlu1 %1040 }
 0x13e   :  { %v1058_v31 = vmul.f32 %v1056_v4, %v1041_v6 }
 0x140   :  { %v1060_v50 = vadd.f32 %v1058_v31, %v1025_v54 }
 0x141   :  { %v1064_v23 = vpop.permute.xlu1 %1063 }
 0x142   :  { %v1092_v25 = vmul.f32 %v1083_v39, %v1064_v23 }
 0x144   :  { %v1094_v59 = vadd.f32 %v1092_v25, %v1060_v50 }
 0x145   :  { %v1068_v24 = vpop.permute.xlu1 %1067 }
 0x146   :  { %v1093_v46 = vmul.f32 %v1089_v58, %v1068_v24  ;;  %v1129_v3 = vadd.f32 %v1127_v10, %v1094_v59 }
 0x148   :  { %v1095_v34 = vadd.f32 %v1093_v46, %v1061_v63 }
 0x14a   :  { %v1114_v51 = vpop.permute.xlu1 %1113 }
 0x14b   :  { %v1128_v38 = vmul.f32 %v1125_v2, %v1114_v51 }
 0x14d   :  { %v1130_v56 = vadd.f32 %v1128_v38, %v1095_v34 }
 0x14e   :  { %v1133_v52 = vpop.permute.xlu1 %1132 }
 0x14f   :  { %v1164_v37 = vadd.f32 %v1162_v61, %v1130_v56  ;;  %v1161_v53 = vmul.f32 %v1528_v27, %v1133_v52 }
 0x151   :  { %1167 = vst.msk [vmem:[#allocation7 + $0x4] sm:$0xf] %vm1165_vm3, %v1164_v37  ;;  %v1163_v48 = vadd.f32 %v1161_v53, %v1129_v3 }
 0x153   :  { %1166 = vst.msk [vmem:[#allocation7] sm:$0xf] %vm1165_vm3, %v1163_v48 }
 0x154   :  { %1296 = shalt.err (!%p1293_p6)
}
 0x155   :  { %s1297_s29 = scalar_lea.hbm %s1836_s5, 128 }
 0x156   :  { %p1298_p7 = scmp.ne.s32.totalorder %s1836_s5, %s1297_s29  ;;  %p1301_p8 = scmp.lt.u32.totalorder %s1297_s29, %s1836_s5 }
 0x158   :  { %p1303_p9 = pnand %p1301_p8, %p1298_p7 }
 0x15a   :  { %1306 = shalt.err (!%p1303_p9)
}
 0x15b   :  { %s1334_s9 = smov 64   ;;  %s1335_s10 = smov 4  }
 0x15c   :  { %1179 = dma.vmem_to_hbm [thread:$0]  %s1174_s25, 128, %s1836_s5, [#allocation4], %s1334_s9, %s1334_s9, %s1335_s10  }
 0x15d   :  { %1311 = dma.done.wait [#allocation4], 128  }
 0x15e   :  { %1312 = vsyncadd [#allocation4], 4294967168 }
 0x15f   :  { %1183 = vsyncpa [#allocation3], 1 }
 0x160   :  { %1184 = vsyncpa [#allocation6], 1 }
 0x161   :  { %1185 = vsyncpa [#allocation4], 1 }

</bundles_post_ra>
